<compile_context>
chip_gen: v7x
topology: tpu7x:2x2x1
jax: 0.10.0
libtpu: 0.0.40
codegen_flags: <defaults>
</compile_context>

<pallas_src>
import functools

import jax
import jax.numpy as jnp
from jax.experimental import pallas as pl
from jax.experimental.pallas import tpu as pltpu

KSIZE = 3                 # kernel_size=3 -> reflection pad width 1
NTAPS = KSIZE * KSIZE


def _round_up(x, m):
    return (x + m - 1) // m * m


def _resnet_block_kernel(x_ref, w1_ref, b1_ref, w2_ref, b2_ref, o_ref,
                         patch_ref, *, H, W, C, K_pad):
    """Fused ResnetBlock for one image, channel-major lane-dense layout.

    x_ref          : (1, C, H*W)   f32   image flattened row-major (h*W + w) on lanes
    w1_ref/w2_ref  : (C, K_pad)    bf16  row co, col tap*C + ci  (tap = kh*3 + kw)
    b1_ref/b2_ref  : (C, 1)        f32
    o_ref          : (1, C, H*W)   f32
    patch_ref      : (K_pad, H*W)  bf16  im2col scratch, HW on lanes
    """
    HW = H * W
    x = x_ref[0]                                            # (C, HW) f32

    # Boundary masks for the separable reflection fixups (built once, reused by both convs).
    lane = jax.lax.broadcasted_iota(jnp.int32, (C, HW), 1)
    if (W & (W - 1)) == 0:                                  # power-of-two W -> bitwise AND
        w_idx = lane & (W - 1)
    else:                                                   # general fallback
        w_idx = lane % W
    at_w0 = w_idx == 0                                      # column w == 0
    at_wl = w_idx == W - 1                                  # column w == W-1
    at_h0 = lane < W                                        # row h == 0
    at_hl = lane >= (H - 1) * W                             # row h == H-1

    def rot(v, shift):
        # static lane rotation; shift normalized to [0, HW) so it is always non-negative
        return pltpu.roll(v, shift % HW, axis=1)

    def write_patches(a):
        # a: (C, HW) f32.  Writes the 9 reflection-padded taps (bf16) into patch_ref.
        # tap(kh, kw)[h, w] == a[reflect(h + kh - 1), reflect(w + kw - 1)]
        for kw in range(KSIZE):
            if kw == 0:    # dw = -1 : a[h, w-1], reflected at w=0 -> a[h, 1]
                cs = jnp.where(at_w0, rot(a, -1), rot(a, 1))
            elif kw == 1:  # dw = 0
                cs = a
            else:          # dw = +1 : a[h, w+1], reflected at w=W-1 -> a[h, W-2]
                cs = jnp.where(at_wl, rot(a, 1), rot(a, -1))
            up = rot(cs, W)      # cs[h-1, w] in the interior
            dn = rot(cs, -W)     # cs[h+1, w] in the interior
            # kh = 0 (dh = -1): reflect row 0 -> row 1
            patch_ref[(0 * KSIZE + kw) * C:(0 * KSIZE + kw + 1) * C, :] = (
                jnp.where(at_h0, dn, up).astype(jnp.bfloat16))
            # kh = 1 (dh = 0)
            patch_ref[(1 * KSIZE + kw) * C:(1 * KSIZE + kw + 1) * C, :] = (
                cs.astype(jnp.bfloat16))
            # kh = 2 (dh = +1): reflect row H-1 -> row H-2
            patch_ref[(2 * KSIZE + kw) * C:(2 * KSIZE + kw + 1) * C, :] = (
                jnp.where(at_hl, up, dn).astype(jnp.bfloat16))

    def conv(w_ref, b_ref):
        # (C, K_pad) @ (K_pad, HW) -> (C, HW), f32 accumulation on the MXU
        y = jnp.dot(w_ref[...], patch_ref[...],
                    preferred_element_type=jnp.float32)
        return y + b_ref[...]

    # Zero the K-padding rows (weights there are zero too; keeps NaN/Inf garbage out).
    if K_pad > NTAPS * C:
        patch_ref[NTAPS * C:K_pad, :] = jnp.zeros(
            (K_pad - NTAPS * C, HW), jnp.bfloat16)

    # ---- conv1 + ReLU -------------------------------------------------------
    write_patches(x)
    y1 = jnp.maximum(conv(w1_ref, b1_ref), 0.0)             # (C, HW) f32

    # ---- conv2 --------------------------------------------------------------
    write_patches(y1)
    y2 = conv(w2_ref, b2_ref)                               # (C, HW) f32

    # ---- residual add, channel-major lane-dense store -----------------------
    o_ref[0] = x + y2


def resnet_block_forward(x_nchw, params):
    """Forward pass matching ResnetBlock.forward (PyTorch NCHW in/out)."""
    N, C, H, W = x_nchw.shape
    HW = H * W
    K = NTAPS * C
    K_pad = _round_up(K, 128)

    x = x_nchw.astype(jnp.float32).reshape(N, C, HW)        # free reshape (no copy)

    def prep_w(w):
        # HWIO (kh, kw, ci, co) -> (co, (kh*3+kw)*C + ci), zero-pad K -> K_pad, bf16
        wm = jnp.transpose(w, (3, 0, 1, 2)).reshape(C, K)
        wm = jnp.pad(wm, ((0, 0), (0, K_pad - K)))
        return wm.astype(jnp.bfloat16)

    w1 = prep_w(params["w1"])
    w2 = prep_w(params["w2"])
    b1 = params["b1"].astype(jnp.float32).reshape(C, 1)
    b2 = params["b2"].astype(jnp.float32).reshape(C, 1)

    kernel = functools.partial(_resnet_block_kernel, H=H, W=W, C=C, K_pad=K_pad)

    flops = N * 2 * 2 * C * K_pad * HW                      # 2 convs per image
    bytes_accessed = (2 * N * C * HW * 4                    # x in + out (f32)
                      + 2 * (C * K_pad * 2 + C * 4))        # weights (bf16) + biases

    out = pl.pallas_call(
        kernel,
        out_shape=jax.ShapeDtypeStruct((N, C, HW), jnp.float32),
        grid=(N,),
        in_specs=[
            pl.BlockSpec((1, C, HW), lambda n: (n, 0, 0)),
            pl.BlockSpec((C, K_pad), lambda n: (0, 0)),
            pl.BlockSpec((C, 1), lambda n: (0, 0)),
            pl.BlockSpec((C, K_pad), lambda n: (0, 0)),
            pl.BlockSpec((C, 1), lambda n: (0, 0)),
        ],
        out_specs=pl.BlockSpec((1, C, HW), lambda n: (n, 0, 0)),
        scratch_shapes=[pltpu.VMEM((K_pad, HW), jnp.bfloat16)],
        compiler_params=pltpu.CompilerParams(
            dimension_semantics=("parallel",)),
        cost_estimate=pl.CostEstimate(flops=flops, transcendentals=0,
                                      bytes_accessed=bytes_accessed),
    )(x, w1, b1, w2, b2)
    return out.reshape(N, C, H, W)                          # free reshape


def _reference_forward(x_nchw, params):
    """Pure-JAX reference (lax conv) matching the kernel's bf16-operand / f32-accum math."""
    x = jnp.transpose(x_nchw, (0, 2, 3, 1)).astype(jnp.float32)  # NHWC
    dn = ("NHWC", "HWIO", "NHWC")

    def conv(inp, w, b):
        ip = jnp.pad(inp, ((0, 0), (1, 1), (1, 1), (0, 0)), mode="reflect")
        y = jax.lax.conv_general_dilated(
            ip.astype(jnp.bfloat16), w.astype(jnp.bfloat16), (1, 1), "VALID",
            dimension_numbers=dn, preferred_element_type=jnp.float32)
        return y + b[None, None, None, :].astype(jnp.float32)

    y1 = jnp.maximum(conv(x, params["w1"], params["b1"]), 0.0)
    y2 = conv(y1, params["w2"], params["b2"])
    return jnp.transpose(x + y2, (0, 3, 1, 2))


if __name__ == "__main__":
    # ResnetBlock(dim=32) at small shapes: batch=2, spatial=16x16
    N, C, H, W = 2, 32, 16, 16
    key = jax.random.PRNGKey(0)
    kx, kw1, kb1, kw2, kb2 = jax.random.split(key, 5)

    x = jax.random.normal(kx, (N, C, H, W), dtype=jnp.float32)
    params = {
        "w1": jax.random.normal(kw1, (KSIZE, KSIZE, C, C), jnp.float32) * 0.05,
        "b1": jax.random.normal(kb1, (C,), jnp.float32) * 0.05,
        "w2": jax.random.normal(kw2, (KSIZE, KSIZE, C, C), jnp.float32) * 0.05,
        "b2": jax.random.normal(kb2, (C,), jnp.float32) * 0.05,
    }

    out = jax.block_until_ready(resnet_block_forward(x, params))
    ref = jax.block_until_ready(_reference_forward(x, params))

    assert out.shape == (N, C, H, W), out.shape
    max_err = float(jnp.max(jnp.abs(out - ref)))
    assert jnp.allclose(out, ref, atol=5e-3, rtol=5e-3), max_err
    print("KERNEL_OK")
</pallas_src>

<mosaic_0001>
module attributes {stable_mosaic.version = 11 : i64} {
  func.func @_resnet_block_kernel(%arg0: i32, %arg1: memref<1x32x256xf32, #tpu.memory_space<vmem>>, %arg2: memref<32x384xbf16, #tpu.memory_space<vmem>>, %arg3: memref<32x1xf32, #tpu.memory_space<vmem>>, %arg4: memref<32x384xbf16, #tpu.memory_space<vmem>>, %arg5: memref<32x1xf32, #tpu.memory_space<vmem>>, %arg6: memref<1x32x256xf32, #tpu.memory_space<vmem>>, %arg7: memref<384x256xbf16, #tpu.memory_space<vmem>>) attributes {dimension_semantics = [#tpu.dimension_semantics<parallel>], iteration_bounds = array<i64: 2>, scalar_prefetch = 0 : i64, scratch_operands = 1 : i64, tpu.core_type = #tpu.core_type<tc>, window_params = [{transform_indices = @transform_0, window_bounds = array<i64: 1, 32, 256>}, {pipeline_mode = #tpu.pipeline_mode<synchronous>, transform_indices = @transform_1, window_bounds = array<i64: 32, 384>}, {pipeline_mode = #tpu.pipeline_mode<synchronous>, transform_indices = @transform_2, window_bounds = array<i64: 32, 1>}, {pipeline_mode = #tpu.pipeline_mode<synchronous>, transform_indices = @transform_3, window_bounds = array<i64: 32, 384>}, {pipeline_mode = #tpu.pipeline_mode<synchronous>, transform_indices = @transform_4, window_bounds = array<i64: 32, 1>}, {transform_indices = @transform_5, window_bounds = array<i64: 1, 32, 256>}]} {
    %c0 = arith.constant 0 : index
    %c0_0 = arith.constant 0 : index
    %c0_1 = arith.constant 0 : index
    %0 = vector.load %arg1[%c0, %c0_0, %c0_1] : memref<1x32x256xf32, #tpu.memory_space<vmem>>, vector<1x32x256xf32>
    %1 = vector.shape_cast %0 : vector<1x32x256xf32> to vector<32x256xf32>
    %2 = tpu.iota {dimensions = array<i32: 1>} : vector<32x256xi32>
    %c15_i32 = arith.constant 15 : i32
    %3 = vector.broadcast %c15_i32 : i32 to vector<32x256xi32>
    %4 = arith.andi %2, %3 : vector<32x256xi32>
    %c0_i32 = arith.constant 0 : i32
    %5 = vector.broadcast %c0_i32 : i32 to vector<32x256xi32>
    %6 = arith.cmpi eq, %4, %5 : vector<32x256xi32>
    %c15_i32_2 = arith.constant 15 : i32
    %7 = vector.broadcast %c15_i32_2 : i32 to vector<32x256xi32>
    %8 = arith.cmpi eq, %4, %7 : vector<32x256xi32>
    %c16_i32 = arith.constant 16 : i32
    %9 = vector.broadcast %c16_i32 : i32 to vector<32x256xi32>
    %10 = arith.cmpi slt, %2, %9 : vector<32x256xi32>
    %c240_i32 = arith.constant 240 : i32
    %11 = vector.broadcast %c240_i32 : i32 to vector<32x256xi32>
    %12 = arith.cmpi sge, %2, %11 : vector<32x256xi32>
    %cst = arith.constant 0.000000e+00 : bf16
    %13 = vector.broadcast %cst : bf16 to vector<96x256xbf16>
    %c288 = arith.constant 288 : index
    %c0_3 = arith.constant 0 : index
    %14 = vector.load %arg7[%c288, %c0_3] : memref<384x256xbf16, #tpu.memory_space<vmem>>, vector<96x256xbf16>
    tpu.vector_store %arg7[%c288, %c0_3], %13 {strides = array<i32>} : memref<384x256xbf16, #tpu.memory_space<vmem>>, vector<96x256xbf16>,
    %c255_i32 = arith.constant 255 : i32
    %15 = tpu.dynamic_rotate %1 by %c255_i32 dim 1 : vector<32x256xf32>, i32 -> vector<32x256xf32>
    %c1_i32 = arith.constant 1 : i32
    %16 = tpu.dynamic_rotate %1 by %c1_i32 dim 1 : vector<32x256xf32>, i32 -> vector<32x256xf32>
    %17 = arith.select %6, %15, %16 : vector<32x256xi1>, vector<32x256xf32>
    %c16_i32_4 = arith.constant 16 : i32
    %18 = tpu.dynamic_rotate %17 by %c16_i32_4 dim 1 : vector<32x256xf32>, i32 -> vector<32x256xf32>
    %c240_i32_5 = arith.constant 240 : i32
    %19 = tpu.dynamic_rotate %17 by %c240_i32_5 dim 1 : vector<32x256xf32>, i32 -> vector<32x256xf32>
    %20 = arith.select %10, %19, %18 : vector<32x256xi1>, vector<32x256xf32>
    %21 = arith.truncf %20 : vector<32x256xf32> to vector<32x256xbf16>
    %c0_6 = arith.constant 0 : index
    %c0_7 = arith.constant 0 : index
    %22 = vector.load %arg7[%c0_6, %c0_7] : memref<384x256xbf16, #tpu.memory_space<vmem>>, vector<32x256xbf16>
    tpu.vector_store %arg7[%c0_6, %c0_7], %21 {strides = array<i32>} : memref<384x256xbf16, #tpu.memory_space<vmem>>, vector<32x256xbf16>,
    %23 = arith.truncf %17 : vector<32x256xf32> to vector<32x256xbf16>
    %c96 = arith.constant 96 : index
    %c0_8 = arith.constant 0 : index
    %24 = vector.load %arg7[%c96, %c0_8] : memref<384x256xbf16, #tpu.memory_space<vmem>>, vector<32x256xbf16>
    tpu.vector_store %arg7[%c96, %c0_8], %23 {strides = array<i32>} : memref<384x256xbf16, #tpu.memory_space<vmem>>, vector<32x256xbf16>,
    %25 = arith.select %12, %18, %19 : vector<32x256xi1>, vector<32x256xf32>
    %26 = arith.truncf %25 : vector<32x256xf32> to vector<32x256xbf16>
    %c192 = arith.constant 192 : index
    %c0_9 = arith.constant 0 : index
    %27 = vector.load %arg7[%c192, %c0_9] : memref<384x256xbf16, #tpu.memory_space<vmem>>, vector<32x256xbf16>
    tpu.vector_store %arg7[%c192, %c0_9], %26 {strides = array<i32>} : memref<384x256xbf16, #tpu.memory_space<vmem>>, vector<32x256xbf16>,
    %c16_i32_10 = arith.constant 16 : i32
    %28 = tpu.dynamic_rotate %1 by %c16_i32_10 dim 1 : vector<32x256xf32>, i32 -> vector<32x256xf32>
    %c240_i32_11 = arith.constant 240 : i32
    %29 = tpu.dynamic_rotate %1 by %c240_i32_11 dim 1 : vector<32x256xf32>, i32 -> vector<32x256xf32>
    %30 = arith.select %10, %29, %28 : vector<32x256xi1>, vector<32x256xf32>
    %31 = arith.truncf %30 : vector<32x256xf32> to vector<32x256xbf16>
    %c32 = arith.constant 32 : index
    %c0_12 = arith.constant 0 : index
    %32 = vector.load %arg7[%c32, %c0_12] : memref<384x256xbf16, #tpu.memory_space<vmem>>, vector<32x256xbf16>
    tpu.vector_store %arg7[%c32, %c0_12], %31 {strides = array<i32>} : memref<384x256xbf16, #tpu.memory_space<vmem>>, vector<32x256xbf16>,
    %33 = arith.truncf %1 : vector<32x256xf32> to vector<32x256xbf16>
    %c128 = arith.constant 128 : index
    %c0_13 = arith.constant 0 : index
    %34 = vector.load %arg7[%c128, %c0_13] : memref<384x256xbf16, #tpu.memory_space<vmem>>, vector<32x256xbf16>
    tpu.vector_store %arg7[%c128, %c0_13], %33 {strides = array<i32>} : memref<384x256xbf16, #tpu.memory_space<vmem>>, vector<32x256xbf16>,
    %35 = arith.select %12, %28, %29 : vector<32x256xi1>, vector<32x256xf32>
    %36 = arith.truncf %35 : vector<32x256xf32> to vector<32x256xbf16>
    %c224 = arith.constant 224 : index
    %c0_14 = arith.constant 0 : index
    %37 = vector.load %arg7[%c224, %c0_14] : memref<384x256xbf16, #tpu.memory_space<vmem>>, vector<32x256xbf16>
    tpu.vector_store %arg7[%c224, %c0_14], %36 {strides = array<i32>} : memref<384x256xbf16, #tpu.memory_space<vmem>>, vector<32x256xbf16>,
    %c1_i32_15 = arith.constant 1 : i32
    %38 = tpu.dynamic_rotate %1 by %c1_i32_15 dim 1 : vector<32x256xf32>, i32 -> vector<32x256xf32>
    %c255_i32_16 = arith.constant 255 : i32
    %39 = tpu.dynamic_rotate %1 by %c255_i32_16 dim 1 : vector<32x256xf32>, i32 -> vector<32x256xf32>
    %40 = arith.select %8, %38, %39 : vector<32x256xi1>, vector<32x256xf32>
    %c16_i32_17 = arith.constant 16 : i32
    %41 = tpu.dynamic_rotate %40 by %c16_i32_17 dim 1 : vector<32x256xf32>, i32 -> vector<32x256xf32>
    %c240_i32_18 = arith.constant 240 : i32
    %42 = tpu.dynamic_rotate %40 by %c240_i32_18 dim 1 : vector<32x256xf32>, i32 -> vector<32x256xf32>
    %43 = arith.select %10, %42, %41 : vector<32x256xi1>, vector<32x256xf32>
    %44 = arith.truncf %43 : vector<32x256xf32> to vector<32x256xbf16>
    %c64 = arith.constant 64 : index
    %c0_19 = arith.constant 0 : index
    %45 = vector.load %arg7[%c64, %c0_19] : memref<384x256xbf16, #tpu.memory_space<vmem>>, vector<32x256xbf16>
    tpu.vector_store %arg7[%c64, %c0_19], %44 {strides = array<i32>} : memref<384x256xbf16, #tpu.memory_space<vmem>>, vector<32x256xbf16>,
    %46 = arith.truncf %40 : vector<32x256xf32> to vector<32x256xbf16>
    %c160 = arith.constant 160 : index
    %c0_20 = arith.constant 0 : index
    %47 = vector.load %arg7[%c160, %c0_20] : memref<384x256xbf16, #tpu.memory_space<vmem>>, vector<32x256xbf16>
    tpu.vector_store %arg7[%c160, %c0_20], %46 {strides = array<i32>} : memref<384x256xbf16, #tpu.memory_space<vmem>>, vector<32x256xbf16>,
    %48 = arith.select %12, %41, %42 : vector<32x256xi1>, vector<32x256xf32>
    %49 = arith.truncf %48 : vector<32x256xf32> to vector<32x256xbf16>
    %c256 = arith.constant 256 : index
    %c0_21 = arith.constant 0 : index
    %50 = vector.load %arg7[%c256, %c0_21] : memref<384x256xbf16, #tpu.memory_space<vmem>>, vector<32x256xbf16>
    tpu.vector_store %arg7[%c256, %c0_21], %49 {strides = array<i32>} : memref<384x256xbf16, #tpu.memory_space<vmem>>, vector<32x256xbf16>,
    %c0_22 = arith.constant 0 : index
    %c0_23 = arith.constant 0 : index
    %51 = vector.load %arg2[%c0_22, %c0_23] : memref<32x384xbf16, #tpu.memory_space<vmem>>, vector<32x384xbf16>
    %c0_24 = arith.constant 0 : index
    %c0_25 = arith.constant 0 : index
    %52 = vector.load %arg7[%c0_24, %c0_25] : memref<384x256xbf16, #tpu.memory_space<vmem>>, vector<384x256xbf16>
    %cst_26 = arith.constant dense<0.000000e+00> : vector<32x256xf32>
    %53 = tpu.matmul %51, %52, %cst_26 {dimension_numbers = #tpu.dot_dimension_numbers<[1], [0], [0], [1], [0, 0, 1, 1], [], []>} : vector<32x384xbf16>, vector<384x256xbf16>, vector<32x256xf32> -> vector<32x256xf32>
    %c0_27 = arith.constant 0 : index
    %c0_28 = arith.constant 0 : index
    %54 = vector.load %arg3[%c0_27, %c0_28] : memref<32x1xf32, #tpu.memory_space<vmem>>, vector<32x1xf32>
    %55 = vector.broadcast %54 : vector<32x1xf32> to vector<32x256xf32>
    %56 = arith.addf %53, %55 : vector<32x256xf32>
    %cst_29 = arith.constant 0.000000e+00 : f32
    %57 = vector.broadcast %cst_29 : f32 to vector<32x256xf32>
    %58 = arith.maximumf %56, %57 : vector<32x256xf32>
    %c255_i32_30 = arith.constant 255 : i32
    %59 = tpu.dynamic_rotate %58 by %c255_i32_30 dim 1 : vector<32x256xf32>, i32 -> vector<32x256xf32>
    %c1_i32_31 = arith.constant 1 : i32
    %60 = tpu.dynamic_rotate %58 by %c1_i32_31 dim 1 : vector<32x256xf32>, i32 -> vector<32x256xf32>
    %61 = arith.select %6, %59, %60 : vector<32x256xi1>, vector<32x256xf32>
    %c16_i32_32 = arith.constant 16 : i32
    %62 = tpu.dynamic_rotate %61 by %c16_i32_32 dim 1 : vector<32x256xf32>, i32 -> vector<32x256xf32>
    %c240_i32_33 = arith.constant 240 : i32
    %63 = tpu.dynamic_rotate %61 by %c240_i32_33 dim 1 : vector<32x256xf32>, i32 -> vector<32x256xf32>
    %64 = arith.select %10, %63, %62 : vector<32x256xi1>, vector<32x256xf32>
    %65 = arith.truncf %64 : vector<32x256xf32> to vector<32x256xbf16>
    %c0_34 = arith.constant 0 : index
    %c0_35 = arith.constant 0 : index
    %66 = vector.load %arg7[%c0_34, %c0_35] : memref<384x256xbf16, #tpu.memory_space<vmem>>, vector<32x256xbf16>
    tpu.vector_store %arg7[%c0_34, %c0_35], %65 {strides = array<i32>} : memref<384x256xbf16, #tpu.memory_space<vmem>>, vector<32x256xbf16>,
    %67 = arith.truncf %61 : vector<32x256xf32> to vector<32x256xbf16>
    %c96_36 = arith.constant 96 : index
    %c0_37 = arith.constant 0 : index
    %68 = vector.load %arg7[%c96_36, %c0_37] : memref<384x256xbf16, #tpu.memory_space<vmem>>, vector<32x256xbf16>
    tpu.vector_store %arg7[%c96_36, %c0_37], %67 {strides = array<i32>} : memref<384x256xbf16, #tpu.memory_space<vmem>>, vector<32x256xbf16>,
    %69 = arith.select %12, %62, %63 : vector<32x256xi1>, vector<32x256xf32>
    %70 = arith.truncf %69 : vector<32x256xf32> to vector<32x256xbf16>
    %c192_38 = arith.constant 192 : index
    %c0_39 = arith.constant 0 : index
    %71 = vector.load %arg7[%c192_38, %c0_39] : memref<384x256xbf16, #tpu.memory_space<vmem>>, vector<32x256xbf16>
    tpu.vector_store %arg7[%c192_38, %c0_39], %70 {strides = array<i32>} : memref<384x256xbf16, #tpu.memory_space<vmem>>, vector<32x256xbf16>,
    %c16_i32_40 = arith.constant 16 : i32
    %72 = tpu.dynamic_rotate %58 by %c16_i32_40 dim 1 : vector<32x256xf32>, i32 -> vector<32x256xf32>
    %c240_i32_41 = arith.constant 240 : i32
    %73 = tpu.dynamic_rotate %58 by %c240_i32_41 dim 1 : vector<32x256xf32>, i32 -> vector<32x256xf32>
    %74 = arith.select %10, %73, %72 : vector<32x256xi1>, vector<32x256xf32>
    %75 = arith.truncf %74 : vector<32x256xf32> to vector<32x256xbf16>
    %c32_42 = arith.constant 32 : index
    %c0_43 = arith.constant 0 : index
    %76 = vector.load %arg7[%c32_42, %c0_43] : memref<384x256xbf16, #tpu.memory_space<vmem>>, vector<32x256xbf16>
    tpu.vector_store %arg7[%c32_42, %c0_43], %75 {strides = array<i32>} : memref<384x256xbf16, #tpu.memory_space<vmem>>, vector<32x256xbf16>,
    %77 = arith.truncf %58 : vector<32x256xf32> to vector<32x256xbf16>
    %c128_44 = arith.constant 128 : index
    %c0_45 = arith.constant 0 : index
    %78 = vector.load %arg7[%c128_44, %c0_45] : memref<384x256xbf16, #tpu.memory_space<vmem>>, vector<32x256xbf16>
    tpu.vector_store %arg7[%c128_44, %c0_45], %77 {strides = array<i32>} : memref<384x256xbf16, #tpu.memory_space<vmem>>, vector<32x256xbf16>,
    %79 = arith.select %12, %72, %73 : vector<32x256xi1>, vector<32x256xf32>
    %80 = arith.truncf %79 : vector<32x256xf32> to vector<32x256xbf16>
    %c224_46 = arith.constant 224 : index
    %c0_47 = arith.constant 0 : index
    %81 = vector.load %arg7[%c224_46, %c0_47] : memref<384x256xbf16, #tpu.memory_space<vmem>>, vector<32x256xbf16>
    tpu.vector_store %arg7[%c224_46, %c0_47], %80 {strides = array<i32>} : memref<384x256xbf16, #tpu.memory_space<vmem>>, vector<32x256xbf16>,
    %c1_i32_48 = arith.constant 1 : i32
    %82 = tpu.dynamic_rotate %58 by %c1_i32_48 dim 1 : vector<32x256xf32>, i32 -> vector<32x256xf32>
    %c255_i32_49 = arith.constant 255 : i32
    %83 = tpu.dynamic_rotate %58 by %c255_i32_49 dim 1 : vector<32x256xf32>, i32 -> vector<32x256xf32>
    %84 = arith.select %8, %82, %83 : vector<32x256xi1>, vector<32x256xf32>
    %c16_i32_50 = arith.constant 16 : i32
    %85 = tpu.dynamic_rotate %84 by %c16_i32_50 dim 1 : vector<32x256xf32>, i32 -> vector<32x256xf32>
    %c240_i32_51 = arith.constant 240 : i32
    %86 = tpu.dynamic_rotate %84 by %c240_i32_51 dim 1 : vector<32x256xf32>, i32 -> vector<32x256xf32>
    %87 = arith.select %10, %86, %85 : vector<32x256xi1>, vector<32x256xf32>
    %88 = arith.truncf %87 : vector<32x256xf32> to vector<32x256xbf16>
    %c64_52 = arith.constant 64 : index
    %c0_53 = arith.constant 0 : index
    %89 = vector.load %arg7[%c64_52, %c0_53] : memref<384x256xbf16, #tpu.memory_space<vmem>>, vector<32x256xbf16>
    tpu.vector_store %arg7[%c64_52, %c0_53], %88 {strides = array<i32>} : memref<384x256xbf16, #tpu.memory_space<vmem>>, vector<32x256xbf16>,
    %90 = arith.truncf %84 : vector<32x256xf32> to vector<32x256xbf16>
    %c160_54 = arith.constant 160 : index
    %c0_55 = arith.constant 0 : index
    %91 = vector.load %arg7[%c160_54, %c0_55] : memref<384x256xbf16, #tpu.memory_space<vmem>>, vector<32x256xbf16>
    tpu.vector_store %arg7[%c160_54, %c0_55], %90 {strides = array<i32>} : memref<384x256xbf16, #tpu.memory_space<vmem>>, vector<32x256xbf16>,
    %92 = arith.select %12, %85, %86 : vector<32x256xi1>, vector<32x256xf32>
    %93 = arith.truncf %92 : vector<32x256xf32> to vector<32x256xbf16>
    %c256_56 = arith.constant 256 : index
    %c0_57 = arith.constant 0 : index
    %94 = vector.load %arg7[%c256_56, %c0_57] : memref<384x256xbf16, #tpu.memory_space<vmem>>, vector<32x256xbf16>
    tpu.vector_store %arg7[%c256_56, %c0_57], %93 {strides = array<i32>} : memref<384x256xbf16, #tpu.memory_space<vmem>>, vector<32x256xbf16>,
    %c0_58 = arith.constant 0 : index
    %c0_59 = arith.constant 0 : index
    %95 = vector.load %arg4[%c0_58, %c0_59] : memref<32x384xbf16, #tpu.memory_space<vmem>>, vector<32x384xbf16>
    %c0_60 = arith.constant 0 : index
    %c0_61 = arith.constant 0 : index
    %96 = vector.load %arg7[%c0_60, %c0_61] : memref<384x256xbf16, #tpu.memory_space<vmem>>, vector<384x256xbf16>
    %cst_62 = arith.constant dense<0.000000e+00> : vector<32x256xf32>
    %97 = tpu.matmul %95, %96, %cst_62 {dimension_numbers = #tpu.dot_dimension_numbers<[1], [0], [0], [1], [0, 0, 1, 1], [], []>} : vector<32x384xbf16>, vector<384x256xbf16>, vector<32x256xf32> -> vector<32x256xf32>
    %c0_63 = arith.constant 0 : index
    %c0_64 = arith.constant 0 : index
    %98 = vector.load %arg5[%c0_63, %c0_64] : memref<32x1xf32, #tpu.memory_space<vmem>>, vector<32x1xf32>
    %99 = vector.broadcast %98 : vector<32x1xf32> to vector<32x256xf32>
    %100 = arith.addf %97, %99 : vector<32x256xf32>
    %101 = arith.addf %1, %100 : vector<32x256xf32>
    %c0_65 = arith.constant 0 : index
    %c0_66 = arith.constant 0 : index
    %c0_67 = arith.constant 0 : index
    %102 = vector.load %arg6[%c0_65, %c0_66, %c0_67] : memref<1x32x256xf32, #tpu.memory_space<vmem>>, vector<1x32x256xf32>
    %103 = vector.shape_cast %102 : vector<1x32x256xf32> to vector<32x256xf32>
    %104 = vector.shape_cast %101 : vector<32x256xf32> to vector<1x32x256xf32>
    tpu.vector_store %arg6[%c0_65, %c0_66, %c0_67], %104 {strides = array<i32>} : memref<1x32x256xf32, #tpu.memory_space<vmem>>, vector<1x32x256xf32>,
    return
  }
  func.func @transform_0(%arg0: i32) -> (i32, i32, i32) {
    %c0_i32 = arith.constant 0 : i32
    %c0_i32_0 = arith.constant 0 : i32
    %c0_i32_1 = arith.constant 0 : i32
    return %arg0, %c0_i32, %c0_i32_0 : i32, i32, i32
  }
  func.func @transform_1(%arg0: i32) -> (i32, i32) {
    %c0_i32 = arith.constant 0 : i32
    %c0_i32_0 = arith.constant 0 : i32
    %c0_i32_1 = arith.constant 0 : i32
    return %c0_i32, %c0_i32_0 : i32, i32
  }
  func.func @transform_2(%arg0: i32) -> (i32, i32) {
    %c0_i32 = arith.constant 0 : i32
    %c0_i32_0 = arith.constant 0 : i32
    %c0_i32_1 = arith.constant 0 : i32
    return %c0_i32, %c0_i32_0 : i32, i32
  }
  func.func @transform_3(%arg0: i32) -> (i32, i32) {
    %c0_i32 = arith.constant 0 : i32
    %c0_i32_0 = arith.constant 0 : i32
    %c0_i32_1 = arith.constant 0 : i32
    return %c0_i32, %c0_i32_0 : i32, i32
  }
  func.func @transform_4(%arg0: i32) -> (i32, i32) {
    %c0_i32 = arith.constant 0 : i32
    %c0_i32_0 = arith.constant 0 : i32
    %c0_i32_1 = arith.constant 0 : i32
    return %c0_i32, %c0_i32_0 : i32, i32
  }
  func.func @transform_5(%arg0: i32) -> (i32, i32, i32) {
    %c0_i32 = arith.constant 0 : i32
    %c0_i32_0 = arith.constant 0 : i32
    %c0_i32_1 = arith.constant 0 : i32
    return %arg0, %c0_i32, %c0_i32_0 : i32, i32, i32
  }
}

</mosaic_0001>

<bundles_post_ra>
// kernel: tpu_custom_call.1
= control target key start
LH: loop header
LB: loop body
LE: loop exit
PB: predicated region body
PF: predicated region fallthrough
CT: control target
= control target key end

     0   :  { %10 = vsyncpa [#allocation4], 0  ;;  %s3655_s0 = inlined_call_operand.hbm [shape: f32[2,32,256], index: 0, kind: input, shape index: {}]   ;;  %s3656_s1 = inlined_call_operand.vmem [shape: bf16[32,384], index: 1, kind: input, shape index: {}]   ;;  %s3657_s2 = inlined_call_operand.vmem [shape: f32[32,1], index: 2, kind: input, shape index: {}]   ;;  %s3658_s3 = inlined_call_operand.hbm [shape: bf16[32,384], index: 3, kind: input, shape index: {}]   ;;  %s3659_s4 = inlined_call_operand.vmem [shape: f32[32,1], index: 4, kind: input, shape index: {}]   ;;  %s3660_s5 = inlined_call_operand.hbm [shape: f32[2,32,256], index: 5, kind: output, shape index: {}]  }
   0x1   :  { %12 = vsyncpa [#allocation4 + $0x1], 0 }
   0x2   :  { %13 = vsyncpa [#allocation7], 0 }
   0x3   :  { %14 = vsyncpa [#allocation5], 0 }
   0x4   :  { %16 = vsyncpa [#allocation5 + $0x1], 0  ;;  %s2156_s18 = smov 0   ;;  %s2158_s19 = smov 0  }
   0x5   :  { %s2160_s20 = smov 0   ;;  %s2162_s21 = smov 0  }
   0x6 LB: > { %s2177_s22 = sadd.s32 4294967295, %s2111_s21   ;;  %s1508_s23 = sadd.s32 4294967294, %s2111_s21   ;;  %s2111_s21 = sphi %s2162_s21, %s3867_s21   ;;  %s2107_s20 = sphi %s2160_s20, %s3866_s20   ;;  %s2103_s19 = sphi %s2158_s19, %s3865_s19   ;;  %s2099_s18 = sphi %s2156_s18, %s3864_s18  }
   0x7   : > { %p42_p0 = scmp.ne.s32.totalorder %s2103_s19, %s2099_s18  ;;  %p3661_p1 = scmp.eq.s32.totalorder %s2177_s22, 0 }
   0x8   : > { %p156_p3 = scmp.eq.s32.totalorder %s1508_s23, 1  ;;  %p1509_p5 = scmp.ge.s32.totalorder %s2111_s21, 1 }
   0x9   : > { %p2186_p4 = por %p3661_p1, %p42_p0  ;;  %p163_p7 = scmp.lt.s32.totalorder %s2111_s21, 3 }
   0xa   : > { %p2191_p6 = por %p156_p3, %p42_p0  ;;  %s2113_s27 = smov [#allocation6]  }
   0xb   : > { %s3730_s24 = scalar_select %p2186_p4, 1, 0 }
   0xc   : > { %s3731_s25 = scalar_select %p2191_p6, 1, 0 }
   0xd   : > { %p2196_p8 = pnand %p1509_p5, %p163_p7  ;;  %s181_s28 = sshll.u32 %s2113_s27, 4  ;;  %s2200_s28 = int_to_ptr.vmem [resolvable:$true] %s181_s28 }
   0xe   : > { %s2212_s30 = sadd.s32 1, %s2111_s21   ;;  %s29_s6 = sadd.s32 1, %s2107_s20 }
   0xf   : > { %s3732_s26 = scalar_select %p2196_p8, 1, 0 }
  0x10   : > { %p1578_p9 = pneg %p2196_p8  ;;  %s26_s7 = ssub.s32 %s2111_s21, %s2212_s30 }
  0x11   : > { %s1983_s10 = scalar_lea.hbm %s3658_s3, 768 }
  0x12   : > { %p2207_p11 = pnand %p1578_p9, %p3661_p1  ;;  %p1984_p12 = scmp.ne.s32.totalorder %s3658_s3, %s1983_s10 }
  0x13   : > { %p1990_p5 = scmp.lt.u32.totalorder %s1983_s10, %s3658_s3 }
  0x14   : > { %p1985_p13 = pneg %p2207_p11 }
  0x16   : > { %p1986_p0 = pnand %p1985_p13, %p1984_p12 }
  0x18   : > { %p1987_p3 = pneg %p1986_p0 }
  0x1a   : > { %p1992_p7 = pnand %p1990_p5, %p1987_p3 }
  0x1c   : > { %1995 = shalt.err (!%p1992_p7)
}
  0x1d   : > { %s1996_s15 = scalar_lea.vmem %s2200_s28, 768  ;;  %p2004_p2 = scmp.lt.s32.totalorder %s2200_s28, %s2200_s28 }
  0x1e   : > { %p1997_p9 = scmp.ne.s32.totalorder %s2200_s28, %s1996_s15  ;;  %p2005_p6 = scmp.lt.s32.totalorder %s1996_s15, %s1996_s15 }
  0x20   : > { %p1999_p10 = pnand %p1997_p9, %p1985_p13  ;;  %p2006_p4 = por %p2005_p6, %p2004_p2 }
  0x22   : > { %p2000_p1 = pneg %p1999_p10 }
  0x24   : > { %p2007_p8 = pnand %p2006_p4, %p2000_p1 }
  0x26   : > { %2010 = shalt.err (!%p2007_p8)
}
  0x27   : > { %s2114_s16 = smov 192   ;;  %s2115_s17 = smov 12  }
  0x28   : > { %1581 = dma.hbm_to_vmem [thread:$0]  (!%p2207_p11), %s3658_s3, 768, %s2200_s28, [#allocation7], %s2114_s16, %s2114_s16, %s2115_s17  }
  0x29   : > { %p27_p2 = scmp.eq.s32.totalorder %s26_s7, 0  ;;  %p36_p1 = scmp.ne.s32.totalorder %s2107_s20, %s2103_s19 }
  0x2a   : > { %p37_p4 = scmp.eq.s32.totalorder %s2111_s21, 0  ;;  %p1591_p6 = scmp.lt.s32.totalorder %s2111_s21, 2 }
  0x2b   : > { %s2243_s8 = scalar_select %p27_p2, %s2107_s20, %s29_s6  }
  0x2c   : > { %p38_p8 = por %p37_p4, %p36_p1  ;;  %p3734_p10 = scmp.eq.s32.totalorder %s2177_s22, 1 }
  0x2d   : > { %s198_s10 = sand.u32 1, %s2107_s20   ;;  %s1536_s11 = sshll.u32 %s2111_s21, 10 }
  0x2e   : > { %p2247_p12 = por %p3734_p10, %p36_p1  ;;  %s1512_s12 = sshll.u32 %s198_s10, 6 }
  0x2f   : > { %s2256_s14 = scalar_lea.hbm %s3655_s0, %s1536_s11  ;;  %s202_s28 = scalar_lea.vmem [#allocation3], %s1512_s12 }
  0x30   : > { %s209_s6 = sshll.u32 %s202_s28, 4  ;;  %p2258_p11 = pnand %p1591_p6, %p38_p8  ;;  %s2262_s6 = int_to_ptr.vmem [resolvable:$true] %s209_s6 }
  0x31   : > { %s2264_s15 = scalar_lea.sflag [#allocation4], %s198_s10  ;;  %s2011_s16 = scalar_lea.hbm %s2256_s14, 1024 }
  0x32   : > { %p2012_p13 = scmp.ne.s32.totalorder %s2256_s14, %s2011_s16  ;;  %p2013_p0 = pneg %p2258_p11 }
  0x33   : > { %s2016_s27 = scalar_lea.hbm %s3655_s0, 2048  ;;  %p2017_p7 = scmp.lt.u32.totalorder %s2256_s14, %s3655_s0 }
  0x34   : > { %p2014_p3 = pnand %p2013_p0, %p2012_p13  ;;  %p2018_p9 = scmp.lt.u32.totalorder %s2016_s27, %s2011_s16 }
  0x35   : > { %p2020_p1 = scmp.lt.u32.totalorder %s2011_s16, %s2256_s14 }
  0x36   : > { %p2015_p5 = pneg %p2014_p3  ;;  %p2019_p2 = por %p2018_p9, %p2017_p7 }
  0x38   : > { %p2021_p4 = por %p2020_p1, %p2019_p2 }
  0x3a   : > { %p2022_p6 = pnand %p2021_p4, %p2015_p5 }
  0x3c   : > { %2025 = shalt.err (!%p2022_p6)
}
  0x3d   : > { %s2026_s10 = scalar_lea.vmem %s2262_s6, 1024  ;;  %s2116_s29 = smov [#allocation3]  }
  0x3e   : > { %p2027_p8 = scmp.ne.s32.totalorder %s2262_s6, %s2026_s10  ;;  %s2031_s13 = sshll.u32 %s2116_s29, 4  ;;  %s2032_s13 = int_to_ptr.vmem [resolvable:$false] %s2031_s13 }
  0x3f   : > { %s2033_s28 = scalar_lea.vmem %s2032_s13, 2048  ;;  %p2034_p3 = scmp.lt.s32.totalorder %s2262_s6, %s2032_s13 }
  0x40   : > { %p2029_p10 = pnand %p2027_p8, %p2013_p0  ;;  %p2035_p7 = scmp.lt.s32.totalorder %s2033_s28, %s2026_s10 }
  0x42   : > { %p2030_p13 = pneg %p2029_p10  ;;  %p2036_p9 = por %p2035_p7, %p2034_p3 }
  0x44   : > { %p2037_p2 = pnand %p2036_p9, %p2030_p13 }
  0x46   : > { %2040 = shalt.err (!%p2037_p2)
}
  0x47   : > { %s2117_s16 = smov 256   ;;  %s2118_s17 = smov 16  }
  0x48   : > { %1585 = dma.hbm_to_vmem [thread:$0]  (!%p2258_p11), %s2256_s14, 1024, %s2262_s6, %s2264_s15, %s2117_s16, %s2117_s16, %s2118_s17  }
  0x49   : > { %p3737_p0 = scmp.ne.s32.totalorder %s3732_s26, 0 }
  0x4b   : > { %221 = sbr.rel (%p3737_p0) target bundleno = 1226 (0x4ca), region = 40 }
  0x52   : > { %s2295_s23 = sand.u32 1, %s2103_s19   ;;  %p3738_p5 = scmp.ne.s32.totalorder %s3730_s24, 0 }
  0x53   : > { %s1516_s27 = sshll.u32 %s2295_s23, 6  ;;  %s224_s11 = scalar_lea.sflag [#allocation4], %s2295_s23 }
  0x54   : > { %s2301_s12 = scalar_lea.vmem [#allocation3], %s1516_s27 }
  0x55   : > { %2086 = dma.done.wait (%p3738_p5), %s224_s11, 1024  }
  0x56   : > { %2088 = vsyncadd (%p3738_p5), %s224_s11, 4294966272  ;;  %p3739_p11 = scmp.eq.s32.totalorder %s2177_s22, 0 }
  0x58   : > { %2090 = dma.done.wait (%p3739_p11), [#allocation7], 768   ;;  %p3740_p1 = pmov %p3739_p11 }
  0x59   : > { %v2312_v0 = vld [vmem:[%s2301_s12] sm:$0xff]  ;;  %v2315_v1 = vld [vmem:[%s2301_s12 + $0x10] sm:$0xff]  ;;  %v2318_v2 = vld [vmem:[%s2301_s12 + $0x8] sm:$0xff]  ;;  %s2119_s24 = smov 1   ;;  %s2120_s26 = smov 127   ;;  %v267_v12 = vlaneseq  ;;  %v3741_v29 = vmov 0 }
  0x5a   : > { %2092 = vsyncadd (%p3740_p1), [#allocation7], 4294966528  ;;  %v1647_v3 = vpack.i.bf16 %v2315_v1, %v2312_v0  ;;  %v2323_v4 = vld [vmem:[%s2301_s12 + $0x18] sm:$0xff]  ;;  %v2326_v5 = vld [vmem:[%s2301_s12 + $0x28] sm:$0xff]  ;;  %s2121_s14 = smov 16   ;;  %s2122_s6 = smov 112  }
  0x5b   : > { %v2329_v6 = vld [vmem:[%s2301_s12 + $0x38] sm:$0xff]  ;;  %v2332_v7 = vld [vmem:[%s2301_s12 + $0x20] sm:$0xff]  ;;  %v2335_v8 = vld [vmem:[%s2301_s12 + $0x30] sm:$0xff]  ;;  %v1652_v9 = vpack.i.bf16 %v2323_v4, %v2318_v2  ;;  %v2359_v13 = vand.u32 127, %v267_v12  ;;  %v3744_v30 = vmov 0  ;;  %s1537_s11 = sshll.u32 %s2177_s22, 10 }
  0x5c   : > { %1648 = vrot.lane.b32.xlu1 %v1647_v3, %s2119_s24  ;;  %1638 = vrot.lane.b32.xlu0 %v1647_v3, %s2120_s26  ;;  %v1662_v10 = vpack.i.bf16 %v2329_v6, %v2326_v5  ;;  %v1657_v11 = vpack.i.bf16 %v2335_v8, %v2332_v7  ;;  %s1412_s22 = scalar_lea.sflag [#allocation5], %s2295_s23  ;;  %s2124_s10 = smov [#allocation8]  }
  0x5d   : > { %v2362_v14 = vadd.s32 128, %v2359_v13  ;;  %v270_v18 = vand.u32 15, %v2359_v13  ;;  %vm333_vm0 = vcmp.lt.s32.totalorder %v2359_v13, 1  ;;  %vm308_vm1 = vcmp.lt.s32.totalorder %v2359_v13, 127  ;;  %s2045_s29 = sshll.u32 %s2124_s10, 4  ;;  %s2046_s29 = int_to_ptr.vmem [resolvable:$false] %s2045_s29 }
  0x5e   : > { %vm276_vm6 = vcmp.lt.s32.totalorder %v2359_v13, 16  ;;  %vm390_vm7 = vcmp.lt.s32.totalorder %v2359_v13, 112  ;;  %s2047_s13 = scalar_lea.vmem %s2046_s29, 2048 }
  0x5f   : > { %v271_v17 = vand.u32 15, %v2362_v14  ;;  %vm2372_vm3 = vcmp.eq.s32.totalorder %v270_v18, 0  ;;  %vm2458_vm5 = vcmp.eq.s32.totalorder %v270_v18, 15  ;;  %vm279_vm8 = vcmp.ge.s32.totalorder %v2362_v14, 240  ;;  %v1973_v14 = vld [vmem:[#allocation6 + $0x8] ss:$12 sps:$4 sm:$0xff]  }
  0x60   : > { %1653 = vrot.lane.b32.xlu1 %v1652_v9, %s2119_s24  ;;  %1643 = vrot.lane.b32.xlu0 %v1652_v9, %s2120_s26  ;;  %v3745_v30 = vsel %vm2372_vm3, 4294967295, %v3744_v30 }
  0x61   : > { %vm2368_vm2 = vcmp.eq.s32.totalorder %v271_v17, 0  ;;  %3746 = vst [vmem:[#allocation13_spill] sm:$0xff] %v3745_v30  ;;  %vm2454_vm4 = vcmp.eq.s32.totalorder %v271_v17, 15 }
  0x62   : > { %v3742_v29 = vsel %vm2368_vm2, 4294967295, %v3741_v29 }
  0x63   : > { %3743 = vst [vmem:[#allocation12_spill] sm:$0xff] %v3742_v29 }
  0x64   : > { %1663 = vrot.lane.b32.xlu1 %v1662_v10, %s2120_s26  ;;  %1658 = vrot.lane.b32.xlu0 %v1657_v11, %s2120_s26 }
  0x68   : > { %1673 = vrot.lane.b32.xlu1 %v1662_v10, %s2119_s24  ;;  %1668 = vrot.lane.b32.xlu0 %v1657_v11, %s2119_s24 }
  0x6c   : > { %1683 = vrot.lane.b32.xlu1 %v1652_v9, %s2121_s14  ;;  %1678 = vrot.lane.b32.xlu0 %v1647_v3, %s2121_s14 }
  0x70   : > { %1693 = vrot.lane.b32.xlu1 %v1652_v9, %s2122_s6  ;;  %1688 = vrot.lane.b32.xlu0 %v1647_v3, %s2122_s6 }
  0x74   : > { %1703 = vrot.lane.b32.xlu1 %v1662_v10, %s2121_s14  ;;  %1698 = vrot.lane.b32.xlu0 %v1657_v11, %s2121_s14 }
  0x78   : > { %1713 = vrot.lane.b32.xlu1 %v1662_v10, %s2122_s6  ;;  %1708 = vrot.lane.b32.xlu0 %v1657_v11, %s2122_s6 }
  0xce   : > { %v1649_v15 = vpop.permute.xlu1 %1648  ;;  %v1639_v16 = vpop.permute.xlu0 %1638 }
  0xcf   : > { %v1651_v19 = vunpack.i.h.bf16 %v1649_v15  ;;  %v1650_v20 = vunpack.i.l.bf16 %v1649_v15  ;;  %v1641_v27 = vunpack.i.h.bf16 %v1639_v16  ;;  %v1640_v28 = vunpack.i.l.bf16 %v1639_v16 }
  0xd2   : > { %v1654_v21 = vpop.permute.xlu1 %1653  ;;  %v1644_v22 = vpop.permute.xlu0 %1643 }
  0xd3   : > { %v1656_v23 = vunpack.i.h.bf16 %v1654_v21  ;;  %v1655_v24 = vunpack.i.l.bf16 %v1654_v21  ;;  %v1646_v25 = vunpack.i.h.bf16 %v1644_v22  ;;  %v1645_v26 = vunpack.i.l.bf16 %v1644_v22 }
  0xd5   : > { %v334_v31 = vsel %vm333_vm0, %v1650_v20, %v1655_v24  ;;  %v335_v32 = vsel %vm333_vm0, %v1651_v19, %v1656_v23  ;;  %v338_v33 = vsel %vm333_vm0, %v1655_v24, %v1650_v20  ;;  %v339_v34 = vsel %vm333_vm0, %v1656_v23, %v1651_v19 }
  0xd6   : > { %v309_v35 = vsel %vm308_vm1, %v1640_v28, %v1645_v26  ;;  %v310_v36 = vsel %vm308_vm1, %v1641_v27, %v1646_v25  ;;  %v313_v37 = vsel %vm308_vm1, %v1645_v26, %v1640_v28  ;;  %v314_v38 = vsel %vm308_vm1, %v1646_v25, %v1641_v27  ;;  %v1664_v39 = vpop.permute.xlu1 %1663  ;;  %v1659_v40 = vpop.permute.xlu0 %1658 }
  0xd7   : > { %v1666_v41 = vunpack.i.h.bf16 %v1664_v39  ;;  %v1665_v42 = vunpack.i.l.bf16 %v1664_v39  ;;  %v1661_v43 = vunpack.i.h.bf16 %v1659_v40  ;;  %v1660_v44 = vunpack.i.l.bf16 %v1659_v40 }
  0xd8   : > { %v2394_v45 = vsel %vm2368_vm2, %v313_v37, %v334_v31  ;;  %v2398_v46 = vsel %vm2368_vm2, %v314_v38, %v335_v32  ;;  %v2402_v47 = vsel %vm2372_vm3, %v309_v35, %v338_v33  ;;  %v2406_v48 = vsel %vm2372_vm3, %v310_v36, %v339_v34 }
  0xd9   : > { %v312_v49 = vsel %vm308_vm1, %v1661_v43, %v1666_v41  ;;  %v316_v50 = vsel %vm308_vm1, %v1666_v41, %v1661_v43  ;;  %v311_v51 = vsel %vm308_vm1, %v1660_v44, %v1665_v42  ;;  %v1722_v52 = vpack.i.bf16 %v2398_v46, %v2394_v45  ;;  %v1961_v41 = vld [vmem:[%s3656_s1 + $0x4] ss:$12 sps:$4 sm:$0xff]   ;;  %v680_v43 = vld [vmem:[%s3657_s2 + $0x8] sm:$0xff] }
  0xda   : > { %v1717_v53 = vpack.i.bf16 %v2406_v48, %v2402_v47  ;;  %v1674_v54 = vpop.permute.xlu1 %1673  ;;  %v1669_v55 = vpop.permute.xlu0 %1668  ;;  %v315_v60 = vsel %vm308_vm1, %v1665_v42, %v1660_v44  ;;  %v3747_v19 = vmov 0  ;;  %v3750_v20 = vmov 0  ;;  %767 = vmatprep.mubr.bf16.mxu0 %v1961_v41  ;;  %v679_v44 = vld [vmem:[%s3657_s2] sm:$0xff] }
  0xdb   : > { %v1676_v56 = vunpack.i.h.bf16 %v1674_v54  ;;  %v1675_v57 = vunpack.i.l.bf16 %v1674_v54  ;;  %v1671_v58 = vunpack.i.h.bf16 %v1669_v55  ;;  %v1670_v59 = vunpack.i.l.bf16 %v1669_v55  ;;  %1723 = vrot.lane.b32.xlu1 %v1722_v52, %s2121_s14 }
  0xdc   : > { %1718 = vrot.lane.b32.xlu0 %v1717_v53, %s2121_s14  ;;  %v3748_v19 = vsel %vm2454_vm4, 4294967295, %v3747_v19  ;;  %v3751_v20 = vsel %vm2458_vm5, 4294967295, %v3750_v20  ;;  %v2466_v22 = vsel %vm2454_vm4, %v334_v31, %v313_v37  ;;  %v2470_v23 = vsel %vm2454_vm4, %v335_v32, %v314_v38 }
  0xdd   : > { %v337_v61 = vsel %vm333_vm0, %v1671_v58, %v1676_v56  ;;  %v341_v62 = vsel %vm333_vm0, %v1676_v56, %v1671_v58  ;;  %v336_v63 = vsel %vm333_vm0, %v1670_v59, %v1675_v57  ;;  %v340_v3 = vsel %vm333_vm0, %v1675_v57, %v1670_v59  ;;  %3749 = vst [vmem:[#allocation14_spill] sm:$0xff] %v3748_v19 }
  0xde   : > { %v2432_v9 = vsel %vm2368_vm2, %v315_v60, %v336_v63  ;;  %v2436_v10 = vsel %vm2368_vm2, %v316_v50, %v337_v61  ;;  %v2440_v11 = vsel %vm2372_vm3, %v311_v51, %v340_v3  ;;  %v2444_v12 = vsel %vm2372_vm3, %v312_v49, %v341_v62  ;;  %3752 = vst [vmem:[#allocation15_spill] sm:$0xff] %v3751_v20 }
  0xdf   : > { %1733 = vrot.lane.b32.xlu1 %v1722_v52, %s2122_s6  ;;  %v1742_v15 = vpack.i.bf16 %v2436_v10, %v2432_v9  ;;  %v1737_v16 = vpack.i.bf16 %v2444_v12, %v2440_v11  ;;  %v2474_v17 = vsel %vm2458_vm5, %v338_v33, %v309_v35  ;;  %v2478_v18 = vsel %vm2458_vm5, %v339_v34, %v310_v36  ;;  %v1679_v52 = vpop.permute.xlu0 %1678 }
  0xe0   : > { %1728 = vrot.lane.b32.xlu0 %v1717_v53, %s2122_s6  ;;  %v1762_v27 = vpack.i.bf16 %v2470_v23, %v2466_v22  ;;  %v1757_v28 = vpack.i.bf16 %v2478_v18, %v2474_v17  ;;  %v2494_v31 = vsel %vm2454_vm4, %v336_v63, %v315_v60  ;;  %v2498_v32 = vsel %vm2454_vm4, %v337_v61, %v316_v50  ;;  %v682_v50 = vld [vmem:[%s3657_s2 + $0x18] sm:$0xff] }
  0xe1   : > { %v2502_v33 = vsel %vm2458_vm5, %v340_v3, %v311_v51  ;;  %v2508_v34 = vsel %vm2458_vm5, %v341_v62, %v312_v49  ;;  %v1782_v39 = vpack.i.bf16 %v2498_v32, %v2494_v31  ;;  %v3664_v42 = vmov 0   ;;  %v681_v49 = vld [vmem:[%s3657_s2 + $0x10] sm:$0xff]  ;;  %v1684_v51 = vpop.permute.xlu1 %1683 }
  0xe2   : > { %v1777_v40 = vpack.i.bf16 %v2508_v34, %v2502_v33  ;;  %1798 = vset.pattern.permute.xlu1 %v3664_v42  ;;  %1797 = vset.pattern.permute.xlu0 %v3664_v42 }
  0xe3   : > { %1743 = vrot.lane.b32.xlu1 %v1742_v15, %s2121_s14  ;;  %v2547_v54 = vpop.permute.xlu0 %1688 }
  0xe4   : > { %1738 = vrot.lane.b32.xlu0 %v1737_v16, %s2121_s14  ;;  %v3672_v38 = vunpack.i.l.bf16 %v2547_v54 }
  0xe5   : > { %v2545_v53 = vpop.permute.xlu1 %1693 }
  0xe6   : > { %v3670_v42 = vunpack.i.h.bf16 %v2545_v53 }
  0xe7   : > { %1753 = vrot.lane.b32.xlu1 %v1742_v15, %s2122_s6  ;;  %v2551_v56 = vpop.permute.xlu0 %1698  ;;  %v1686_v15 = vunpack.i.h.bf16 %v1684_v51 }
  0xe8   : > { %1748 = vrot.lane.b32.xlu0 %v1737_v16, %s2122_s6 }
  0xe9   : > { %v2549_v55 = vpop.permute.xlu1 %1703 }
  0xeb   : > { %1763 = vrot.lane.b32.xlu1 %v1762_v27, %s2121_s14  ;;  %v2555_v58 = vpop.permute.xlu0 %1708 }
  0xec   : > { %1758 = vrot.lane.b32.xlu0 %v1757_v28, %s2121_s14  ;;  %3754 = vst [vmem:[#allocation17_spill] sm:$0xff] %v2555_v58 }
  0xed   : > { %v2553_v57 = vpop.permute.xlu1 %1713 }
  0xee   : > { %3753 = vst [vmem:[#allocation16_spill] sm:$0xff] %v2553_v57 }
  0xef   : > { %1773 = vrot.lane.b32.xlu1 %v1762_v27, %s2122_s6 }
  0xf0   : > { %1768 = vrot.lane.b32.xlu0 %v1757_v28, %s2122_s6  ;;  %v1685_v28 = vunpack.i.l.bf16 %v1684_v51  ;;  %v3671_v51 = vunpack.i.l.bf16 %v2545_v53 }
  0xf3   : > { %1783 = vrot.lane.b32.xlu1 %v1782_v39, %s2121_s14 }
  0xf4   : > { %1778 = vrot.lane.b32.xlu0 %v1777_v40, %s2121_s14 }
  0xf7   : > { %1793 = vrot.lane.b32.xlu1 %v1782_v39, %s2122_s6  ;;  %v1681_v39 = vunpack.i.h.bf16 %v1679_v52 }
  0xf8   : > { %1788 = vrot.lane.b32.xlu0 %v1777_v40, %s2122_s6  ;;  %v1680_v40 = vunpack.i.l.bf16 %v1679_v52  ;;  %v3673_v52 = vunpack.i.h.bf16 %v2547_v54 }
  0xfa   : > { %v459_v24 = vsel %vm276_vm6, %v1685_v28, %v1680_v40 }
  0xfb   : > { %690 = vperm.xlu1 %1798, %v680_v43  }
  0xfc   : > { %685 = vperm.xlu0 %1797, %v679_v44  }
  0xff   : > { %695 = vperm.xlu1 %1798, %v681_v49  }
 0x100   : > { %700 = vperm.xlu0 %1797, %v682_v50  }
 0x14d   : > { %v1724_v59 = vpop.permute.xlu1 %1723 }
 0x14e   : > { %v1719_v60 = vpop.permute.xlu0 %1718  ;;  %v1726_v61 = vunpack.i.h.bf16 %v1724_v59  ;;  %v1725_v62 = vunpack.i.l.bf16 %v1724_v59 }
 0x14f   : > { %v1721_v63 = vunpack.i.h.bf16 %v1719_v60  ;;  %v1720_v3 = vunpack.i.l.bf16 %v1719_v60 }
 0x151   : > { %v2561_v16 = vsel %vm276_vm6, %v1720_v3, %v1725_v62  ;;  %v2565_v27 = vsel %vm276_vm6, %v1721_v63, %v1726_v61  ;;  %v2567_v41 = vpop.permute.xlu1 %1733  ;;  %v370_v37 = vsel %vm276_vm6, %v1725_v62, %v1720_v3  ;;  %v371_v36 = vsel %vm276_vm6, %v1726_v61, %v1721_v63 }
 0x152   : > { %v2569_v43 = vpop.permute.xlu0 %1728  ;;  %v408_v44 = vpack.c.bf16 %v2565_v27, %v2561_v16  ;;  %v3668_v49 = vunpack.i.h.bf16 %v2567_v41  ;;  %v3666_v50 = vunpack.i.l.bf16 %v2567_v41  ;;  %v460_v62 = vsel %vm276_vm6, %v1686_v15, %v1681_v39 }
 0x153   : > { %v3669_v59 = vunpack.i.h.bf16 %v2569_v43  ;;  %v3667_v60 = vunpack.i.l.bf16 %v2569_v43 }
 0x154   : > { %735 = vmatprep.subr.bf16.mxu0 %v408_v44 }
 0x155   : > { %v2591_v35 = vsel %vm390_vm7, %v3667_v60, %v3666_v50  ;;  %v2599_v44 = vsel %vm390_vm7, %v3669_v59, %v3668_v49  ;;  %v1744_v61 = vpop.permute.xlu1 %1743  ;;  %v2611_v60 = vsel %vm276_vm6, %v1681_v39, %v1686_v15  ;;  %v2625_v15 = vsel %vm276_vm6, %v1680_v40, %v1685_v28 }
 0x156   : > { %v1739_v63 = vpop.permute.xlu0 %1738  ;;  %v399_v3 = vsel %vm276_vm6, %v2591_v35, %v370_v37  ;;  %v401_v50 = vsel %vm276_vm6, %v2599_v44, %v371_v36  ;;  %v1746_v26 = vunpack.i.h.bf16 %v1744_v61  ;;  %v1745_v49 = vunpack.i.l.bf16 %v1744_v61 }
 0x157   : > { %v1741_v59 = vunpack.i.h.bf16 %v1739_v63  ;;  %v1740_v25 = vunpack.i.l.bf16 %v1739_v63  ;;  %v2621_v37 = vsel %vm390_vm7, %v3673_v52, %v3670_v42  ;;  %v407_v36 = vpack.c.bf16 %v401_v50, %v399_v3 }
 0x158   : > { %3755 = vst [vmem:[#allocation18_spill] sm:$0xff] %v2621_v37  ;;  %v2633_v39 = vsel %vm390_vm7, %v3672_v38, %v3671_v51  ;;  %v1706_v61 = vunpack.i.h.bf16 %v2549_v55  ;;  %v1705_v28 = vunpack.i.l.bf16 %v2549_v55  ;;  %v1701_v40 = vunpack.i.h.bf16 %v2551_v56 }
 0x159   : > { %3756 = vst [vmem:[#allocation19_spill] sm:$0xff] %v2633_v39  ;;  %v2638_v63 = vsel %vm276_vm6, %v1740_v25, %v1745_v49  ;;  %v2642_v50 = vsel %vm276_vm6, %v1741_v59, %v1746_v26  ;;  %v1700_v3 = vunpack.i.l.bf16 %v2551_v56  ;;  %736 = vmatpush1.bf16.msra.mxu0 %v407_v36  ;;  %v2647_v42 = vpop.permute.xlu1 %1753  ;;  %v3688_v36 = vunpack.i.h.bf16 %v2555_v58 }
 0x15a   : > { %v2649_v51 = vpop.permute.xlu0 %1748  ;;  %v410_v38 = vpack.c.bf16 %v2642_v50, %v2638_v63  ;;  %v373_v29 = vsel %vm276_vm6, %v1746_v26, %v1741_v59  ;;  %v372_v52 = vsel %vm276_vm6, %v1745_v49, %v1740_v25  ;;  %v3757_v21 = vunpack.i.h.bf16 %v2647_v42 }
 0x15b   : > { %v3682_v20 = vunpack.i.h.bf16 %v2649_v51  ;;  %v3683_v55 = vunpack.i.l.bf16 %v2649_v51  ;;  %v3759_v56 = vunpack.i.l.bf16 %v2647_v42 }
 0x15c   : > { %737 = vmatprep.subr.bf16.mxu0 %v410_v38 }
 0x15d   : > { %v2671_v19 = vsel %vm390_vm7, %v3682_v20, %v3757_v21  ;;  %v2679_v38 = vsel %vm390_vm7, %v3683_v55, %v3759_v56  ;;  %v1764_v26 = vpop.permute.xlu1 %1763  ;;  %v496_v21 = vpack.c.bf16 %v2611_v60, %v2625_v15  ;;  %v487_v20 = vsel %vm276_vm6, %v2633_v39, %v459_v24 }
 0x15e   : > { %3758 = vst [vmem:[#allocation20_spill] sm:$0xff] %v2671_v19  ;;  %3760 = vst [vmem:[#allocation21_spill] sm:$0xff] %v2679_v38  ;;  %v1759_v59 = vpop.permute.xlu0 %1758  ;;  %v403_v25 = vsel %vm276_vm6, %v2679_v38, %v372_v52  ;;  %v405_v49 = vsel %vm276_vm6, %v2671_v19, %v373_v29  ;;  %v462_v56 = vsel %vm276_vm6, %v1706_v61, %v1701_v40  ;;  %v3761_v29 = vunpack.i.h.bf16 %v2553_v57 }
 0x15f   : > { %v461_v55 = vsel %vm276_vm6, %v1705_v28, %v1700_v3  ;;  %v409_v30 = vpack.c.bf16 %v405_v49, %v403_v25  ;;  %v489_v52 = vsel %vm276_vm6, %v2621_v37, %v460_v62  ;;  %v3763_v24 = vunpack.i.l.bf16 %v2553_v57 }
 0x160   : > { %v2705_v19 = vsel %vm390_vm7, %v3688_v36, %v3761_v29  ;;  %v3764_v39 = vunpack.i.l.bf16 %v2555_v58  ;;  %v2717_v25 = vsel %vm276_vm6, %v1700_v3, %v1705_v28  ;;  %v2721_v62 = vsel %vm276_vm6, %v1701_v40, %v1706_v61 }
 0x161   : > { %3762 = vst [vmem:[#allocation22_spill] sm:$0xff] %v2705_v19  ;;  %v1766_v49 = vunpack.i.h.bf16 %v1764_v26  ;;  %v1765_v37 = vunpack.i.l.bf16 %v1764_v26  ;;  %v1761_v29 = vunpack.i.h.bf16 %v1759_v59  ;;  %v1760_v36 = vunpack.i.l.bf16 %v1759_v59  ;;  %738 = vmatpush1.bf16.msra.mxu0 %v409_v30  ;;  %v2723_v57 = vpop.permute.xlu1 %1773 }
 0x162   : > { %v2713_v38 = vsel %vm390_vm7, %v3764_v39, %v3763_v24  ;;  %3766 = vst [vmem:[#allocation24_spill] sm:$0xff] %v2723_v57  ;;  %v2725_v58 = vpop.permute.xlu0 %1768  ;;  %v3693_v39 = vunpack.i.h.bf16 %v2723_v57  ;;  %v3697_v24 = vunpack.i.l.bf16 %v2723_v57  ;;  %739 = vmatprep.subr.bf16.mxu0 %v496_v21  ;;  %v495_v61 = vpack.c.bf16 %v489_v52, %v487_v20 }
 0x163   : > { %3765 = vst [vmem:[#allocation23_spill] sm:$0xff] %v2713_v38  ;;  %3767 = vst [vmem:[#allocation25_spill] sm:$0xff] %v2725_v58  ;;  %v3694_v28 = vunpack.i.h.bf16 %v2725_v58  ;;  %v3698_v3 = vunpack.i.l.bf16 %v2725_v58  ;;  %v498_v40 = vpack.c.bf16 %v2721_v62, %v2717_v25  ;;  %v491_v30 = vsel %vm276_vm6, %v2713_v38, %v461_v55 }
 0x164   : > { %v493_v26 = vsel %vm276_vm6, %v2705_v19, %v462_v56  ;;  %v2757_v56 = vsel %vm276_vm6, %v1760_v36, %v1765_v37  ;;  %v2761_v52 = vsel %vm276_vm6, %v1761_v29, %v1766_v49 }
 0x165   : > { %v2745_v59 = vsel %vm390_vm7, %v3694_v28, %v3693_v39  ;;  %v2753_v20 = vsel %vm390_vm7, %v3698_v3, %v3697_v24  ;;  %740 = vmatpush1.bf16.msra.mxu0 %v495_v61  ;;  %v1784_v55 = vpop.permute.xlu1 %1783  ;;  %v556_v24 = vsel %vm276_vm6, %v1766_v49, %v1761_v29  ;;  %v555_v61 = vsel %vm276_vm6, %v1765_v37, %v1760_v36 }
 0x166   : > { %3768 = vst [vmem:[#allocation26_spill] sm:$0xff] %v2745_v59  ;;  %v1779_v21 = vpop.permute.xlu0 %1778  ;;  %v1786_v39 = vunpack.i.h.bf16 %v1784_v55  ;;  %v1785_v28 = vunpack.i.l.bf16 %v1784_v55  ;;  %741 = vmatprep.subr.bf16.mxu0 %v498_v40  ;;  %v497_v3 = vpack.c.bf16 %v493_v26, %v491_v30  ;;  %v592_v57 = vpack.c.bf16 %v2761_v52, %v2757_v56 }
 0x167   : > { %v1781_v19 = vunpack.i.h.bf16 %v1779_v21  ;;  %v1780_v38 = vunpack.i.l.bf16 %v1779_v21  ;;  %v583_v58 = vsel %vm276_vm6, %v2753_v20, %v555_v61  ;;  %v585_v55 = vsel %vm276_vm6, %v2745_v59, %v556_v24 }
 0x168   : > { %v591_v26 = vpack.c.bf16 %v585_v55, %v583_v58  ;;  %v3770_v55 = vpack.c.bf16 %v2406_v48, %v2402_v47  ;;  %v3773_v47 = vunpack.i.l.bf16 %v2569_v43  ;;  %v3775_v48 = vunpack.i.h.bf16 %v2569_v43 }
 0x169   : > { %742 = vmatpush1.bf16.msra.mxu0 %v497_v3  ;;  %v2775_v40 = vpop.permute.xlu1 %1793  ;;  %v2781_v37 = vsel %vm276_vm6, %v1780_v38, %v1785_v28  ;;  %v2785_v36 = vsel %vm276_vm6, %v1781_v19, %v1786_v39  ;;  %v558_v3 = vsel %vm276_vm6, %v1786_v39, %v1781_v19  ;;  %v557_v61 = vsel %vm276_vm6, %v1785_v28, %v1780_v38 }
 0x16a   : > { %v2777_v21 = vpop.permute.xlu0 %1788  ;;  %v1796_v49 = vunpack.i.h.bf16 %v2775_v40  ;;  %v1795_v29 = vunpack.i.l.bf16 %v2775_v40  ;;  %743 = vmatprep.subr.bf16.mxu0 %v592_v57  ;;  %v594_v19 = vpack.c.bf16 %v2785_v36, %v2781_v37  ;;  %v3769_v28 = vpack.c.bf16 %v2398_v46, %v2394_v45 }
 0x16b   : > { %v1791_v30 = vunpack.i.h.bf16 %v2777_v21  ;;  %v1790_v24 = vunpack.i.l.bf16 %v2777_v21  ;;  %v506_v45 = vpack.c.bf16 %v2329_v6, %v2326_v5  ;;  %v505_v46 = vpack.c.bf16 %v2335_v8, %v2332_v7  ;;  %v1962_v21 = vld [vmem:[%s3656_s1 + $0x1c] ss:$12 sps:$4 sm:$0xff]  }
 0x16c   : > { %v3777_v5 = vpack.c.bf16 %v2470_v23, %v2466_v22  ;;  %v3778_v8 = vpack.c.bf16 %v2478_v18, %v2474_v17  ;;  %v3782_v22 = vunpack.i.l.bf16 %v2647_v42  ;;  %v3784_v18 = vpack.c.bf16 %v2508_v34, %v2502_v33 }
 0x16d   : > { %v2801_v59 = vsel %vm390_vm7, %v1791_v30, %v1796_v49  ;;  %v2809_v57 = vsel %vm390_vm7, %v1790_v24, %v1795_v29  ;;  %744 = vmatpush1.bf16.msra.mxu0 %v591_v26  ;;  %v3771_v26 = vpack.c.bf16 %v2436_v10, %v2432_v9  ;;  %v3779_v9 = vunpack.i.h.bf16 %v2649_v51 }
 0x16e   : > { %v587_v58 = vsel %vm276_vm6, %v2809_v57, %v557_v61  ;;  %v589_v38 = vsel %vm276_vm6, %v2801_v59, %v558_v3  ;;  %745 = vmatprep.subr.bf16.mxu0 %v594_v19  ;;  %v504_v61 = vpack.c.bf16 %v2323_v4, %v2318_v2  ;;  %v3772_v3 = vpack.c.bf16 %v2444_v12, %v2440_v11 }
 0x16f   : > { %v593_v39 = vpack.c.bf16 %v589_v38, %v587_v58  ;;  %v503_v19 = vpack.c.bf16 %v2315_v1, %v2312_v0  ;;  %v3774_v2 = vunpack.i.l.bf16 %v2567_v41  ;;  %v3776_v0 = vunpack.i.h.bf16 %v2567_v41 }
 0x170   : > { %v3780_v10 = vunpack.i.h.bf16 %v2647_v42  ;;  %v3781_v12 = vunpack.i.l.bf16 %v2649_v51  ;;  %v3785_v41 = vunpack.i.h.bf16 %v2547_v54  ;;  %v3786_v43 = vunpack.i.h.bf16 %v2545_v53 }
 0x171   : > { %746 = vmatpush1.bf16.msra.mxu0 %v593_v39  ;;  %v395_v4 = vsel %vm390_vm7, %v3774_v2, %v3773_v47  ;;  %v396_v1 = vsel %vm390_vm7, %v3776_v0, %v3775_v48  ;;  %v3788_v33 = vunpack.i.l.bf16 %v2545_v53  ;;  %v431_v51 = vpack.c.bf16 %v2599_v44, %v2591_v35  ;;  %v3791_v53 = vld [vmem:[#allocation16_spill] sm:$0xff] }
 0x172   : > { %747 = vmatprep.subr.bf16.mxu0 %v3769_v28  ;;  %v424_v6 = vsel %vm279_vm8, %v2561_v16, %v395_v4  ;;  %v426_v7 = vsel %vm279_vm8, %v2565_v27, %v396_v1  ;;  %v398_v11 = vsel %vm390_vm7, %v3780_v10, %v3779_v9  ;;  %v397_v23 = vsel %vm390_vm7, %v3782_v22, %v3781_v12  ;;  %v3799_v47 = vld [vmem:[#allocation24_spill] sm:$0xff] }
 0x173   : > { %v3783_v16 = vpack.c.bf16 %v2498_v32, %v2494_v31  ;;  %v432_v17 = vpack.c.bf16 %v426_v7, %v424_v6  ;;  %v428_v27 = vsel %vm279_vm8, %v2638_v63, %v397_v23  ;;  %v430_v42 = vsel %vm279_vm8, %v2642_v50, %v398_v11  ;;  %v3806_v11 = vld [vmem:[#allocation22_spill] sm:$0xff] }
 0x174   : > { %v484_v31 = vsel %vm390_vm7, %v3786_v43, %v3785_v41  ;;  %v3787_v32 = vunpack.i.l.bf16 %v2547_v54  ;;  %v434_v63 = vpack.c.bf16 %v430_v42, %v428_v27  ;;  %v3789_v54 = vld [vmem:[#allocation17_spill] sm:$0xff]  ;;  %v3792_v39 = vunpack.i.h.bf16 %v3791_v53 }
 0x175   : > { %748 = vmatpush1.bf16.msra.mxu0 %v3770_v55  ;;  %v514_v58 = vsel %vm279_vm8, %v2611_v60, %v484_v31  ;;  %v3790_v38 = vunpack.i.h.bf16 %v3789_v54  ;;  %v3793_v55 = vunpack.i.l.bf16 %v3789_v54  ;;  %v3794_v35 = vunpack.i.l.bf16 %v3791_v53 }
 0x176   : > { %749 = vmatprep.subr.bf16.mxu0 %v3771_v26  ;;  %v483_v34 = vsel %vm390_vm7, %v3788_v33, %v3787_v32  ;;  %v3796_v26 = vld [vmem:[#allocation20_spill] sm:$0xff]  ;;  %v3800_v2 = vunpack.i.h.bf16 %v3799_v47  ;;  %v3802_v0 = vunpack.i.l.bf16 %v3799_v47  ;;  %v582_v9 = vsel %vm390_vm7, %v1796_v49, %v1791_v30 }
 0x177   : > { %v512_v50 = vsel %vm279_vm8, %v2625_v15, %v483_v34  ;;  %v486_v28 = vsel %vm390_vm7, %v3792_v39, %v3790_v38  ;;  %v485_v44 = vsel %vm390_vm7, %v3794_v35, %v3793_v55  ;;  %v3795_v15 = vld [vmem:[#allocation21_spill] sm:$0xff]  ;;  %v581_v10 = vsel %vm390_vm7, %v1795_v29, %v1790_v24  ;;  %v3807_v29 = vld [vmem:[#allocation26_spill] sm:$0xff] }
 0x178   : > { %v516_v60 = vsel %vm279_vm8, %v2717_v25, %v485_v44  ;;  %v3803_v25 = vld [vmem:[#allocation19_spill] sm:$0xff]  ;;  %v612_v49 = vsel %vm279_vm8, %v2781_v37, %v581_v10  ;;  %v614_v40 = vsel %vm279_vm8, %v2785_v36, %v582_v9  ;;  %v615_v30 = vpack.c.bf16 %v3807_v29, %v2753_v20  ;;  %v1964_v36 = vld [vmem:[%s3656_s1 + $0x18] ss:$12 sps:$4 sm:$0xff]  }
 0x179   : > { %750 = vmatpush1.bf16.msra.mxu0 %v3772_v3  ;;  %v520_v3 = vpack.c.bf16 %v514_v58, %v512_v50  ;;  %v618_v24 = vpack.c.bf16 %v614_v40, %v612_v49  ;;  %v617_v37 = vpack.c.bf16 %v2801_v59, %v2809_v57  ;;  %v3808_v23 = vmov 0   ;;  %v1965_v20 = vld [vmem:[%s3656_s1 + $0x8] ss:$12 sps:$4 sm:$0xff]  }
 0x17a   : > { %751 = vmatprep.subr.bf16.mxu0 %v504_v61  ;;  %v433_v61 = vpack.c.bf16 %v3796_v26, %v3795_v15  ;;  %v691_v27 = vpop.permute.xlu1 %690 }
 0x17b   : > { %v686_v59 = vpop.permute.xlu0 %685 }
 0x17d   : > { %752 = vmatpush1.bf16.msra.mxu0 %v503_v19  ;;  %v518_v19 = vsel %vm279_vm8, %v2721_v62, %v486_v28 }
 0x17e   : > { %753 = vmatprep.subr.bf16.mxu0 %v506_v45  ;;  %v3797_v45 = vld [vmem:[#allocation25_spill] sm:$0xff]  ;;  %v522_v7 = vpack.c.bf16 %v518_v19, %v516_v60  ;;  %v696_v58 = vpop.permute.xlu1 %695 }
 0x17f   : > { %v3801_v48 = vunpack.i.l.bf16 %v3797_v45  ;;  %v701_v35 = vpop.permute.xlu0 %700 }
 0x181   : > { %754 = vmatpush1.bf16.msra.mxu0 %v505_v46  ;;  %v3798_v46 = vunpack.i.h.bf16 %v3797_v45  ;;  %v579_v1 = vsel %vm390_vm7, %v3802_v0, %v3801_v48 }
 0x182   : > { %755 = vmatprep.subr.bf16.mxu0 %v3777_v5  ;;  %v3804_v5 = vld [vmem:[#allocation18_spill] sm:$0xff]  ;;  %v608_v62 = vsel %vm279_vm8, %v2757_v56, %v579_v1  ;;  %v3805_v56 = vld [vmem:[#allocation23_spill] sm:$0xff] }
 0x183   : > { %v580_v4 = vsel %vm390_vm7, %v3800_v2, %v3798_v46  ;;  %v519_v6 = vpack.c.bf16 %v3804_v5, %v3803_v25  ;;  %v521_v12 = vpack.c.bf16 %v3806_v11, %v3805_v56 }
 0x185   : > { %756 = vmatpush1.bf16.msra.mxu0 %v3778_v8  ;;  %v610_v8 = vsel %vm279_vm8, %v2761_v52, %v580_v4  ;;  %v1959_v52 = vld [vmem:[%s3656_s1] ss:$12 sps:$4 sm:$0xff]  }
 0x186   : > { %757 = vmatprep.subr.bf16.mxu0 %v3783_v16  ;;  %v616_v22 = vpack.c.bf16 %v610_v8, %v608_v62  ;;  %v1966_v16 = vld [vmem:[%s3656_s1 + $0x20] ss:$12 sps:$4 sm:$0xff]  }
 0x189   : > { %758 = vmatpush1.bf16.msra.mxu0 %v3784_v18 }
 0x18a   : > { %759 = vmatprep.subr.bf16.mxu0 %v432_v17 }
 0x18d   : > { %760 = vmatpush1.bf16.msra.mxu0 %v431_v51 }
 0x18e   : > { %761 = vmatprep.subr.bf16.mxu0 %v434_v63 }
 0x191   : > { %762 = vmatpush1.bf16.msra.mxu0 %v433_v61 }
 0x192   : > { %763 = vmatprep.subr.bf16.mxu0 %v520_v3 }
 0x195   : > { %764 = vmatpush1.bf16.msra.mxu0 %v519_v6 }
 0x196   : > { %765 = vmatprep.subr.bf16.mxu0 %v522_v7 }
 0x199   : > { %766 = vmatpush1.bf16.msra.mxu0 %v521_v12 }
 0x19a   : > { %788 = vmatprep.subr.bf16.mxu0 %v616_v22 }
 0x19c   : > { %768 = vmatmul.mubr.bf16.vlgmr.msra.gmra.mrb[0].mxu0 %v1959_v52 }
 0x19d   : > { %789 = vmatpush1.bf16.msra.mxu0 %v615_v30  ;;  %777 = vmatprep.mubr.bf16.mxu0 %v1962_v21 }
 0x19e   : > { %790 = vmatprep.subr.bf16.mxu0 %v618_v24 }
 0x1a1   : > { %791 = vmatpush1.bf16.msra.mxu0 %v617_v37  ;;  %v1236_v37 = vld [vmem:[%s3659_s4 + $0x18] sm:$0xff] }
 0x1a4   : > { %778 = vmatmul.mubr.bf16.gmra.mrb[4].mxu0 %v1964_v36 }
 0x1a5   : > { %820 = vmatprep.mubr.bf16.mxu0 %v3808_v23 }
 0x1ac   : > { %821 = vmatmul.mubr.bf16.vlgmr.msra.gmra.mrb[0].mxu0 %v1965_v20 }
 0x1ad   : > { %830 = vmatprep.mubr.bf16.mxu0 %v3808_v23 }
 0x1b4   : > { %831 = vmatmul.mubr.bf16.gmra.mrb[4].mxu0 %v1966_v16 }
 0x27f   : > { %v822_v57 = vpop.f32.mrb[0].mxu0 }
 0x280   : > { %v1538_v17 = vadd.f32 %v822_v57, %v686_v59  ;;  %v824_v18 = vpop.f32.mrb[1].mxu0 }
 0x281   : > { %v1539_v42 = vadd.f32 %v824_v18, %v686_v59  ;;  %v826_v41 = vpop.f32.mrb[2].mxu0 }
 0x282   : > { %v1540_v43 = vadd.f32 %v826_v41, %v691_v27  ;;  %v828_v31 = vpop.f32.mrb[3].mxu0  ;;  %v841_v33 = vmax.f32 %v1538_v17, 0.0 }
 0x283   : > { %v1541_v32 = vadd.f32 %v828_v31, %v691_v27  ;;  %v842_v51 = vmax.f32 %v1539_v42, 0.0 }
 0x284   : > { %v843_v34 = vmax.f32 %v1540_v43, 0.0 }
 0x285   : > { %v844_v63 = vmax.f32 %v1541_v32, 0.0 }
 0x286   : > { %v1799_v50 = vpack.i.bf16 %v843_v34, %v841_v33  ;;  %v2992_v55 = vpack.c.bf16 %v843_v34, %v841_v33 }
 0x287   : > { %v832_v54 = vpop.f32.mrb[4].mxu0  ;;  %v1809_v38 = vpack.i.bf16 %v844_v63, %v842_v51  ;;  %v2990_v28 = vpack.c.bf16 %v844_v63, %v842_v51 }
 0x288   : > { %v1542_v53 = vadd.f32 %v832_v54, %v696_v58  ;;  %v834_v39 = vpop.f32.mrb[5].mxu0  ;;  %1800 = vrot.lane.b32.xlu1 %v1799_v50, %s2120_s26 }
 0x289   : > { %v1543_v44 = vadd.f32 %v834_v39, %v696_v58  ;;  %v836_v15 = vpop.f32.mrb[6].mxu0  ;;  %1810 = vrot.lane.b32.xlu0 %v1809_v38, %s2120_s26 }
 0x28a   : > { %v1544_v26 = vadd.f32 %v836_v15, %v701_v35  ;;  %v838_v61 = vpop.f32.mrb[7].mxu0  ;;  %v845_v60 = vmax.f32 %v1542_v53, 0.0 }
 0x28b   : > { %v1545_v3 = vadd.f32 %v838_v61, %v701_v35  ;;  %v846_v45 = vmax.f32 %v1543_v44, 0.0 }
 0x28c   : > { %v847_v19 = vmax.f32 %v1544_v26, 0.0  ;;  %1805 = vrot.lane.b32.xlu1 %v1799_v50, %s2119_s24 }
 0x28d   : > { %v848_v46 = vmax.f32 %v1545_v3, 0.0  ;;  %1815 = vrot.lane.b32.xlu0 %v1809_v38, %s2119_s24 }
 0x28e   : > { %v1819_v47 = vpack.i.bf16 %v847_v19, %v845_v60  ;;  %v3000_v48 = vpack.c.bf16 %v847_v19, %v845_v60 }
 0x28f   : > { %v1829_v2 = vpack.i.bf16 %v848_v46, %v846_v45  ;;  %v2998_v4 = vpack.c.bf16 %v848_v46, %v846_v45 }
 0x290   : > { %1820 = vrot.lane.b32.xlu1 %v1819_v47, %s2120_s26 }
 0x291   : > { %1830 = vrot.lane.b32.xlu0 %v1829_v2, %s2120_s26 }
 0x294   : > { %1825 = vrot.lane.b32.xlu1 %v1819_v47, %s2119_s24 }
 0x295   : > { %1835 = vrot.lane.b32.xlu0 %v1829_v2, %s2119_s24  ;;  %s3608_s24 = scalar_lea.hbm %s3660_s5, %s1537_s11 }
 0x298   : > { %1840 = vrot.lane.b32.xlu1 %v1799_v50, %s2121_s14 }
 0x299   : > { %1845 = vrot.lane.b32.xlu0 %v1809_v38, %s2121_s14 }
 0x29c   : > { %1850 = vrot.lane.b32.xlu1 %v1799_v50, %s2122_s6 }
 0x29d   : > { %1855 = vrot.lane.b32.xlu0 %v1809_v38, %s2122_s6 }
 0x2a0   : > { %1860 = vrot.lane.b32.xlu1 %v1819_v47, %s2121_s14 }
 0x2a1   : > { %1870 = vrot.lane.b32.xlu0 %v1829_v2, %s2121_s14 }
 0x2a4   : > { %1865 = vrot.lane.b32.xlu1 %v1819_v47, %s2122_s6 }
 0x2a5   : > { %1875 = vrot.lane.b32.xlu0 %v1829_v2, %s2122_s6 }
 0x2fa   : > { %v1801_v0 = vpop.permute.xlu1 %1800 }
 0x2fb   : > { %v1811_v1 = vpop.permute.xlu0 %1810  ;;  %v1803_v25 = vunpack.i.h.bf16 %v1801_v0  ;;  %v1802_v5 = vunpack.i.l.bf16 %v1801_v0 }
 0x2fc   : > { %v1813_v6 = vunpack.i.h.bf16 %v1811_v1  ;;  %v1812_v7 = vunpack.i.l.bf16 %v1811_v1 }
 0x2fe   : > { %v1806_v62 = vpop.permute.xlu1 %1805  ;;  %v869_v12 = vsel %vm308_vm1, %v1812_v7, %v1802_v5  ;;  %v870_v22 = vsel %vm308_vm1, %v1813_v6, %v1803_v25  ;;  %v865_v30 = vsel %vm308_vm1, %v1802_v5, %v1812_v7  ;;  %v866_v16 = vsel %vm308_vm1, %v1803_v25, %v1813_v6 }
 0x2ff   : > { %v1808_v8 = vunpack.i.h.bf16 %v1806_v62  ;;  %v1807_v9 = vunpack.i.l.bf16 %v1806_v62  ;;  %v1816_v10 = vpop.permute.xlu0 %1815 }
 0x300   : > { %v1818_v56 = vunpack.i.h.bf16 %v1816_v10  ;;  %v1817_v11 = vunpack.i.l.bf16 %v1816_v10 }
 0x302   : > { %v889_v52 = vsel %vm333_vm0, %v1807_v9, %v1817_v11  ;;  %v890_v49 = vsel %vm333_vm0, %v1808_v8, %v1818_v56  ;;  %v893_v40 = vsel %vm333_vm0, %v1817_v11, %v1807_v9  ;;  %v894_v21 = vsel %vm333_vm0, %v1818_v56, %v1808_v8  ;;  %v1821_v29 = vpop.permute.xlu1 %1820 }
 0x303   : > { %v1831_v24 = vpop.permute.xlu0 %1830  ;;  %v3029_v36 = vsel %vm2368_vm2, %v869_v12, %v889_v52  ;;  %v3033_v20 = vsel %vm2368_vm2, %v870_v22, %v890_v49  ;;  %v1823_v59 = vunpack.i.h.bf16 %v1821_v29  ;;  %v3041_v18 = vsel %vm2372_vm3, %v865_v30, %v893_v40 }
 0x304   : > { %v1884_v57 = vpack.i.bf16 %v3033_v20, %v3029_v36  ;;  %v1822_v27 = vunpack.i.l.bf16 %v1821_v29  ;;  %v1833_v42 = vunpack.i.h.bf16 %v1831_v24  ;;  %v1832_v41 = vunpack.i.l.bf16 %v1831_v24  ;;  %v1233_v24 = vld [vmem:[%s3659_s4] sm:$0xff] }
 0x305   : > { %v3045_v43 = vsel %vm2372_vm3, %v866_v16, %v894_v21  ;;  %v3097_v0 = vsel %vm2454_vm4, %v889_v52, %v869_v12  ;;  %v3101_v1 = vsel %vm2454_vm4, %v890_v49, %v870_v22  ;;  %v3108_v6 = vsel %vm2458_vm5, %v893_v40, %v865_v30  ;;  %v1234_v30 = vld [vmem:[%s3659_s4 + $0x8] sm:$0xff] }
 0x306   : > { %v1826_v31 = vpop.permute.xlu1 %1825  ;;  %1885 = vrot.lane.b32.xlu0 %v1884_v57, %s2121_s14  ;;  %v1879_v34 = vpack.i.bf16 %v3045_v43, %v3041_v18  ;;  %v871_v58 = vsel %vm308_vm1, %v1832_v41, %v1822_v27  ;;  %v872_v54 = vsel %vm308_vm1, %v1833_v42, %v1823_v59  ;;  %v867_v26 = vsel %vm308_vm1, %v1822_v27, %v1832_v41 }
 0x307   : > { %v1828_v32 = vunpack.i.h.bf16 %v1826_v31  ;;  %v1827_v33 = vunpack.i.l.bf16 %v1826_v31  ;;  %v1836_v51 = vpop.permute.xlu0 %1835  ;;  %v868_v60 = vsel %vm308_vm1, %v1823_v59, %v1833_v42  ;;  %v1924_v25 = vpack.i.bf16 %v3101_v1, %v3097_v0  ;;  %v1969_v59 = vld [vmem:[#allocation6 + $0x4] ss:$12 sps:$4 sm:$0xff]  }
 0x308   : > { %v1838_v63 = vunpack.i.h.bf16 %v1836_v51  ;;  %v1837_v50 = vunpack.i.l.bf16 %v1836_v51  ;;  %1880 = vrot.lane.b32.xlu1 %v1879_v34, %s2121_s14  ;;  %v3112_v7 = vsel %vm2458_vm5, %v894_v21, %v866_v16  ;;  %v1235_v16 = vld [vmem:[%s3659_s4 + $0x10] sm:$0xff]  ;;  %1321 = vmatprep.mubr.bf16.mxu1 %v1969_v59 }
 0x309   : > { %v1914_v22 = vpack.i.bf16 %v3112_v7, %v3108_v6 }
 0x30a   : > { %v891_v39 = vsel %vm333_vm0, %v1827_v33, %v1837_v50  ;;  %v892_v35 = vsel %vm333_vm0, %v1828_v32, %v1838_v63  ;;  %v895_v44 = vsel %vm333_vm0, %v1837_v50, %v1827_v33  ;;  %v896_v15 = vsel %vm333_vm0, %v1838_v63, %v1828_v32  ;;  %1895 = vrot.lane.b32.xlu0 %v1884_v57, %s2122_s6  ;;  %v1841_v17 = vpop.permute.xlu1 %1840 }
 0x30b   : > { %v3072_v61 = vsel %vm2368_vm2, %v871_v58, %v891_v39  ;;  %v3076_v3 = vsel %vm2368_vm2, %v872_v54, %v892_v35  ;;  %v3084_v45 = vsel %vm2372_vm3, %v867_v26, %v895_v44  ;;  %v3089_v46 = vsel %vm2372_vm3, %v868_v60, %v896_v15  ;;  %v1846_v57 = vpop.permute.xlu0 %1845 }
 0x30c   : > { %v1904_v19 = vpack.i.bf16 %v3076_v3, %v3072_v61  ;;  %1890 = vrot.lane.b32.xlu1 %v1879_v34, %s2122_s6  ;;  %v1899_v47 = vpack.i.bf16 %v3089_v46, %v3084_v45  ;;  %v3116_v62 = vsel %vm2454_vm4, %v891_v39, %v871_v58  ;;  %v3121_v8 = vsel %vm2454_vm4, %v892_v35, %v872_v54 }
 0x30d   : > { %v3132_v11 = vsel %vm2458_vm5, %v895_v44, %v867_v26  ;;  %v3136_v12 = vsel %vm2458_vm5, %v896_v15, %v868_v60  ;;  %v1944_v21 = vpack.i.bf16 %v3121_v8, %v3116_v62  ;;  %v1843_v60 = vunpack.i.h.bf16 %v1841_v17 }
 0x30e   : > { %1905 = vrot.lane.b32.xlu0 %v1904_v19, %s2121_s14  ;;  %v1939_v29 = vpack.i.bf16 %v3136_v12, %v3132_v11  ;;  %v3171_v42 = vpop.permute.xlu1 %1850  ;;  %v1847_v5 = vunpack.i.l.bf16 %v1846_v57 }
 0x30f   : > { %v3169_v27 = vpop.permute.xlu0 %1855 }
 0x310   : > { %1900 = vrot.lane.b32.xlu1 %v1899_v47, %s2121_s14 }
 0x312   : > { %1920 = vrot.lane.b32.xlu0 %v1904_v19, %s2122_s6  ;;  %v3175_v31 = vpop.permute.xlu1 %1860  ;;  %v1842_v19 = vunpack.i.l.bf16 %v1841_v17 }
 0x313   : > { %v3173_v41 = vpop.permute.xlu0 %1870 }
 0x314   : > { %1910 = vrot.lane.b32.xlu1 %v1899_v47, %s2122_s6  ;;  %v1873_v9 = vunpack.i.h.bf16 %v3173_v41  ;;  %v1872_v53 = vunpack.i.l.bf16 %v3173_v41 }
 0x316   : > { %1925 = vrot.lane.b32.xlu0 %v1924_v25, %s2121_s14  ;;  %v3179_v33 = vpop.permute.xlu1 %1865 }
 0x317   : > { %v3177_v32 = vpop.permute.xlu0 %1875 }
 0x318   : > { %1915 = vrot.lane.b32.xlu1 %v1914_v22, %s2121_s14 }
 0x31a   : > { %1935 = vrot.lane.b32.xlu0 %v1924_v25, %s2122_s6  ;;  %v1848_v25 = vunpack.i.h.bf16 %v1846_v57 }
 0x31c   : > { %1930 = vrot.lane.b32.xlu1 %v1914_v22, %s2122_s6  ;;  %v1014_v56 = vsel %vm276_vm6, %v1848_v25, %v1843_v60 }
 0x31e   : > { %1945 = vrot.lane.b32.xlu0 %v1944_v21, %s2121_s14 }
 0x320   : > { %1940 = vrot.lane.b32.xlu1 %v1939_v29, %s2121_s14 }
 0x322   : > { %1955 = vrot.lane.b32.xlu0 %v1944_v21, %s2122_s6 }
 0x324   : > { %1950 = vrot.lane.b32.xlu1 %v1939_v29, %s2122_s6  ;;  %s3587_s6 = scalar_lea.vmem [#allocation8], %s1516_s27 }
 0x325   : > { %s1425_s27 = sshll.u32 %s3587_s6, 4  ;;  %s3599_s27 = int_to_ptr.vmem [resolvable:$true] %s1425_s27 }
 0x326   : > { %1244 = vperm.xlu0 %1797, %v1234_v30   ;;  %v3706_v30 = vunpack.i.l.bf16 %v3171_v42  ;;  %s2041_s26 = scalar_lea.vmem %s3599_s27, 1024  ;;  %p2048_p10 = scmp.lt.s32.totalorder %s3599_s27, %s2046_s29 }
 0x327   : > { %p2042_p4 = scmp.ne.s32.totalorder %s3599_s27, %s2041_s26  ;;  %p2049_p13 = scmp.lt.s32.totalorder %s2047_s13, %s2041_s26 }
 0x328   : > { %1239 = vperm.xlu1 %1798, %v1233_v24   ;;  %v3705_v24 = vunpack.i.l.bf16 %v3169_v27 }
 0x329   : > { %p2043_p6 = pnand %p2042_p4, %p2247_p12  ;;  %p2050_p3 = por %p2049_p13, %p2048_p10 }
 0x32a   : > { %1254 = vperm.xlu0 %1797, %v1236_v37  }
 0x32b   : > { %p2044_p8 = pneg %p2043_p6 }
 0x32c   : > { %1249 = vperm.xlu1 %1798, %v1235_v16  }
 0x32d   : > { %p2051_p7 = pnand %p2050_p3, %p2044_p8 }
 0x378   : > { %v1886_v34 = vpop.permute.xlu0 %1885 }
 0x379   : > { %v1888_v51 = vunpack.i.h.bf16 %v1886_v34  ;;  %v1887_v63 = vunpack.i.l.bf16 %v1886_v34 }
 0x37a   : > { %v1881_v50 = vpop.permute.xlu1 %1880 }
 0x37b   : > { %v1883_v58 = vunpack.i.h.bf16 %v1881_v50  ;;  %v1882_v54 = vunpack.i.l.bf16 %v1881_v50 }
 0x37c   : > { %v3181_v39 = vpop.permute.xlu0 %1895 }
 0x37d   : > { %v3704_v35 = vunpack.i.h.bf16 %v3181_v39  ;;  %v3708_v44 = vunpack.i.l.bf16 %v3181_v39  ;;  %v3187_v15 = vsel %vm276_vm6, %v1882_v54, %v1887_v63  ;;  %v3191_v26 = vsel %vm276_vm6, %v1883_v58, %v1888_v51 }
 0x37e   : > { %v3193_v47 = vpop.permute.xlu1 %1890  ;;  %v962_v2 = vpack.c.bf16 %v3191_v26, %v3187_v15  ;;  %v925_v37 = vsel %vm276_vm6, %v1887_v63, %v1882_v54  ;;  %v926_v16 = vsel %vm276_vm6, %v1888_v51, %v1883_v58  ;;  %v3711_v51 = vunpack.i.h.bf16 %v3171_v42 }
 0x37f   : > { %v3707_v22 = vunpack.i.h.bf16 %v3193_v47  ;;  %v3709_v21 = vunpack.i.l.bf16 %v3193_v47  ;;  %v3710_v63 = vunpack.i.h.bf16 %v3169_v27 }
 0x380   : > { %v1906_v29 = vpop.permute.xlu0 %1905  ;;  %1289 = vmatprep.subr.bf16.mxu1 %v962_v2  ;;  %v1013_v2 = vsel %vm276_vm6, %v1847_v5, %v1842_v19 }
 0x381   : > { %v1908_v59 = vunpack.i.h.bf16 %v1906_v29  ;;  %v1907_v17 = vunpack.i.l.bf16 %v1906_v29  ;;  %v3211_v57 = vsel %vm390_vm7, %v3709_v21, %v3708_v44  ;;  %v3219_v34 = vsel %vm390_vm7, %v3707_v22, %v3704_v35 }
 0x382   : > { %v1901_v50 = vpop.permute.xlu1 %1900  ;;  %v953_v58 = vsel %vm276_vm6, %v3211_v57, %v925_v37  ;;  %v955_v54 = vsel %vm276_vm6, %v3219_v34, %v926_v16  ;;  %v3241_v37 = vsel %vm390_vm7, %v3706_v30, %v3705_v24  ;;  %v3245_v16 = vsel %vm276_vm6, %v1842_v19, %v1847_v5 }
 0x383   : > { %v1903_v29 = vunpack.i.h.bf16 %v1901_v50  ;;  %v1902_v40 = vunpack.i.l.bf16 %v1901_v50  ;;  %v961_v49 = vpack.c.bf16 %v955_v54, %v953_v58  ;;  %3813 = vst [vmem:[#allocation17_spill] sm:$0xff] %v3241_v37  ;;  %v3249_v50 = vsel %vm276_vm6, %v1843_v60, %v1848_v25 }
 0x384   : > { %v3231_v52 = vpop.permute.xlu0 %1920  ;;  %v3267_v60 = vsel %vm390_vm7, %v3711_v51, %v3710_v63  ;;  %v3719_v19 = vunpack.i.l.bf16 %v3179_v33  ;;  %v3718_v22 = vunpack.i.l.bf16 %v3177_v32  ;;  %v1863_v63 = vunpack.i.h.bf16 %v3175_v31 }
 0x385   : > { %1290 = vmatpush1.bf16.msra.mxu1 %v961_v49  ;;  %v3714_v58 = vunpack.i.h.bf16 %v3231_v52  ;;  %v3712_v54 = vunpack.i.l.bf16 %v3231_v52  ;;  %v3255_v35 = vsel %vm276_vm6, %v1902_v40, %v1907_v17  ;;  %v3259_v24 = vsel %vm276_vm6, %v1903_v29, %v1908_v59  ;;  %3814 = vst [vmem:[#allocation16_spill] sm:$0xff] %v3267_v60 }
 0x386   : > { %v3271_v25 = vpop.permute.xlu1 %1910  ;;  %v964_v5 = vpack.c.bf16 %v3259_v24, %v3255_v35  ;;  %v1862_v51 = vunpack.i.l.bf16 %v3175_v31  ;;  %v928_v38 = vsel %vm276_vm6, %v1908_v59, %v1903_v29  ;;  %v927_v49 = vsel %vm276_vm6, %v1907_v17, %v1902_v40 }
 0x387   : > { %v3715_v44 = vunpack.i.h.bf16 %v3271_v25  ;;  %v3713_v21 = vunpack.i.l.bf16 %v3271_v25  ;;  %v1050_v17 = vpack.c.bf16 %v3249_v50, %v3245_v16  ;;  %v1041_v29 = vsel %vm276_vm6, %v3241_v37, %v1013_v2 }
 0x388   : > { %v1926_v10 = vpop.permute.xlu0 %1925  ;;  %1291 = vmatprep.subr.bf16.mxu1 %v964_v5  ;;  %v3320_v5 = vsel %vm390_vm7, %v3719_v19, %v3718_v22  ;;  %v1043_v2 = vsel %vm276_vm6, %v3267_v60, %v1014_v56  ;;  %v1015_v56 = vsel %vm276_vm6, %v1872_v53, %v1862_v51 }
 0x389   : > { %v3293_v30 = vsel %vm390_vm7, %v3715_v44, %v3714_v58  ;;  %v3301_v41 = vsel %vm390_vm7, %v3713_v21, %v3712_v54  ;;  %3816 = vst [vmem:[#allocation20_spill] sm:$0xff] %v3320_v5  ;;  %v3818_v54 = vunpack.i.h.bf16 %v3179_v33  ;;  %v1928_v44 = vunpack.i.h.bf16 %v1926_v10 }
 0x38a   : > { %3815 = vst [vmem:[#allocation21_spill] sm:$0xff] %v3293_v30  ;;  %v1916_v31 = vpop.permute.xlu1 %1915  ;;  %v957_v40 = vsel %vm276_vm6, %v3301_v41, %v927_v49  ;;  %v959_v59 = vsel %vm276_vm6, %v3293_v30, %v928_v38  ;;  %v3817_v49 = vunpack.i.h.bf16 %v3177_v32  ;;  %v1927_v23 = vunpack.i.l.bf16 %v1926_v10 }
 0x38b   : > { %v963_v21 = vpack.c.bf16 %v959_v59, %v957_v40  ;;  %v1918_v37 = vunpack.i.h.bf16 %v1916_v31  ;;  %v1917_v22 = vunpack.i.l.bf16 %v1916_v31  ;;  %v3343_v40 = vsel %vm276_vm6, %v1863_v63, %v1873_v9 }
 0x38c   : > { %v3328_v38 = vsel %vm390_vm7, %v3818_v54, %v3817_v49  ;;  %v3330_v58 = vpop.permute.xlu0 %1935  ;;  %v3339_v54 = vsel %vm276_vm6, %v1862_v51, %v1872_v53  ;;  %3822 = vst [vmem:[#allocation18_spill] sm:$0xff] %v3343_v40  ;;  %v1016_v10 = vsel %vm276_vm6, %v1873_v9, %v1863_v63  ;;  %v1045_v19 = vsel %vm276_vm6, %v3320_v5, %v1015_v56 }
 0x38d   : > { %3819 = vst [vmem:[#allocation25_spill] sm:$0xff] %v3328_v38  ;;  %3820 = vst [vmem:[#allocation24_spill] sm:$0xff] %v3330_v58  ;;  %1292 = vmatpush1.bf16.msra.mxu1 %v963_v21  ;;  %v1049_v21 = vpack.c.bf16 %v1043_v2, %v1041_v29  ;;  %v1047_v53 = vsel %vm276_vm6, %v3328_v38, %v1016_v10  ;;  %v1052_v9 = vpack.c.bf16 %v3343_v40, %v3339_v54 }
 0x38e   : > { %3821 = vst [vmem:[#allocation19_spill] sm:$0xff] %v3339_v54  ;;  %v3349_v31 = vpop.permute.xlu1 %1930  ;;  %1293 = vmatprep.subr.bf16.mxu1 %v1050_v17  ;;  %v3363_v51 = vsel %vm276_vm6, %v1917_v22, %v1927_v23  ;;  %v3367_v63 = vsel %vm276_vm6, %v1918_v37, %v1928_v44  ;;  %v3823_v17 = vunpack.i.h.bf16 %v3330_v58  ;;  %v3824_v2 = vunpack.i.l.bf16 %v3330_v58 }
 0x38f   : > { %v3725_v59 = vunpack.i.h.bf16 %v3349_v31  ;;  %v3729_v49 = vunpack.i.l.bf16 %v3349_v31  ;;  %v1051_v60 = vpack.c.bf16 %v1047_v53, %v1045_v19  ;;  %v1110_v40 = vsel %vm276_vm6, %v1928_v44, %v1918_v37 }
 0x390   : > { %v1946_v30 = vpop.permute.xlu0 %1945 }
 0x391   : > { %v3375_v29 = vsel %vm390_vm7, %v3725_v59, %v3823_v17  ;;  %v3383_v56 = vsel %vm390_vm7, %v3729_v49, %v3824_v2  ;;  %1294 = vmatpush1.bf16.msra.mxu1 %v1049_v21  ;;  %v1948_v10 = vunpack.i.h.bf16 %v1946_v30  ;;  %v1947_v38 = vunpack.i.l.bf16 %v1946_v30 }
 0x392   : > { %v1941_v5 = vpop.permute.xlu1 %1940  ;;  %1295 = vmatprep.subr.bf16.mxu1 %v1052_v9  ;;  %v1109_v17 = vsel %vm276_vm6, %v1927_v23, %v1917_v22  ;;  %v1146_v2 = vpack.c.bf16 %v3367_v63, %v3363_v51  ;;  %v1139_v19 = vsel %vm276_vm6, %v3375_v29, %v1110_v40  ;;  %v1169_v13 = vpack.c.bf16 %v3375_v29, %v3383_v56  ;;  %v1974_v29 = vld [vmem:[#allocation6 + $0x20] ss:$12 sps:$4 sm:$0xff]  }
 0x393   : > { %v1943_v59 = vunpack.i.h.bf16 %v1941_v5  ;;  %v1942_v58 = vunpack.i.l.bf16 %v1941_v5  ;;  %v1137_v30 = vsel %vm276_vm6, %v3383_v56, %v1109_v17 }
 0x394   : > { %v3389_v54 = vpop.permute.xlu0 %1955 }
 0x395   : > { %1296 = vmatpush1.bf16.msra.mxu1 %v1051_v60  ;;  %v1958_v44 = vunpack.i.h.bf16 %v3389_v54  ;;  %v1957_v23 = vunpack.i.l.bf16 %v3389_v54  ;;  %v3403_v22 = vsel %vm276_vm6, %v1942_v58, %v1947_v38  ;;  %v3407_v37 = vsel %vm276_vm6, %v1943_v59, %v1948_v10 }
 0x396   : > { %v3409_v5 = vpop.permute.xlu1 %1950  ;;  %1297 = vmatprep.subr.bf16.mxu1 %v1146_v2  ;;  %v1145_v60 = vpack.c.bf16 %v1139_v19, %v1137_v30  ;;  %v1148_v53 = vpack.c.bf16 %v3407_v37, %v3403_v22  ;;  %v1112_v9 = vsel %vm276_vm6, %v1948_v10, %v1943_v59  ;;  %v1111_v17 = vsel %vm276_vm6, %v1947_v38, %v1942_v58 }
 0x397   : > { %v1953_v21 = vunpack.i.h.bf16 %v3409_v5  ;;  %v1952_v40 = vunpack.i.l.bf16 %v3409_v5  ;;  %v3825_v10 = vpack.c.bf16 %v3033_v20, %v3029_v36  ;;  %v3826_v30 = vpack.c.bf16 %v3045_v43, %v3041_v18 }
 0x398   : > { %v3827_v19 = vpack.c.bf16 %v3076_v3, %v3072_v61  ;;  %v3828_v5 = vpack.c.bf16 %v3089_v46, %v3084_v45  ;;  %v3829_v36 = vunpack.i.l.bf16 %v3193_v47  ;;  %v3830_v20 = vunpack.i.l.bf16 %v3181_v39 }
 0x399   : > { %v3423_v49 = vsel %vm390_vm7, %v1953_v21, %v1958_v44  ;;  %v3429_v2 = vsel %vm390_vm7, %v1952_v40, %v1957_v23  ;;  %1298 = vmatpush1.bf16.msra.mxu1 %v1145_v60  ;;  %v3831_v43 = vunpack.i.h.bf16 %v3193_v47  ;;  %v3832_v61 = vunpack.i.h.bf16 %v3181_v39 }
 0x39a   : > { %1299 = vmatprep.subr.bf16.mxu1 %v1148_v53  ;;  %v1141_v59 = vsel %vm276_vm6, %v3429_v2, %v1111_v17  ;;  %v1143_v58 = vsel %vm276_vm6, %v3423_v49, %v1112_v9  ;;  %v949_v18 = vsel %vm390_vm7, %v3830_v20, %v3829_v36  ;;  %v3834_v3 = vpack.c.bf16 %v3112_v7, %v3108_v6 }
 0x39b   : > { %v1147_v38 = vpack.c.bf16 %v1143_v58, %v1141_v59  ;;  %v3835_v45 = vunpack.i.h.bf16 %v3271_v25  ;;  %v3836_v46 = vunpack.i.h.bf16 %v3231_v52  ;;  %v3838_v39 = vunpack.i.l.bf16 %v3231_v52 }
 0x39c   : > { %v3840_v7 = vpack.c.bf16 %v3136_v12, %v3132_v11  ;;  %v3842_v60 = vunpack.i.l.bf16 %v3169_v27  ;;  %v3844_v11 = vunpack.i.h.bf16 %v3169_v27  ;;  %v3846_v27 = vunpack.i.l.bf16 %v3177_v32 }
 0x39d   : > { %1300 = vmatpush1.bf16.msra.mxu1 %v1147_v38  ;;  %v3847_v59 = vunpack.i.h.bf16 %v3179_v33  ;;  %v3855_v20 = vunpack.i.l.bf16 %v3349_v31 }
 0x39e   : > { %1301 = vmatprep.subr.bf16.mxu1 %v3825_v10 }
 0x3a1   : > { %1302 = vmatpush1.bf16.msra.mxu1 %v3826_v30  ;;  %v3851_v30 = vld [vmem:[#allocation18_spill] sm:$0xff] }
 0x3a2   : > { %1303 = vmatprep.subr.bf16.mxu1 %v3827_v19 }
 0x3a5   : > { %1304 = vmatpush1.bf16.msra.mxu1 %v3828_v5 }
 0x3a6   : > { %1305 = vmatprep.subr.bf16.mxu1 %v2990_v28  ;;  %v950_v28 = vsel %vm390_vm7, %v3832_v61, %v3831_v43  ;;  %v3857_v43 = vld [vmem:[#allocation17_spill] sm:$0xff]  ;;  %v3858_v61 = vld [vmem:[#allocation16_spill] sm:$0xff] }
 0x3a7   : > { %v1240_v56 = vpop.permute.xlu1 %1239 }
 0x3a9   : > { %1306 = vmatpush1.bf16.msra.mxu1 %v2992_v55  ;;  %v3833_v55 = vpack.c.bf16 %v3101_v1, %v3097_v0  ;;  %v952_v0 = vsel %vm390_vm7, %v3836_v46, %v3835_v45  ;;  %v3837_v1 = vunpack.i.l.bf16 %v3271_v25  ;;  %v3841_v25 = vunpack.i.l.bf16 %v3171_v42  ;;  %v3859_v45 = vld [vmem:[#allocation20_spill] sm:$0xff]  ;;  %v3860_v46 = vld [vmem:[#allocation25_spill] sm:$0xff] }
 0x3aa   : > { %1307 = vmatprep.subr.bf16.mxu1 %v2998_v4  ;;  %v978_v4 = vsel %vm279_vm8, %v3187_v15, %v949_v18  ;;  %v984_v52 = vsel %vm279_vm8, %v3259_v24, %v952_v0  ;;  %v1075_v0 = vpack.c.bf16 %v3860_v46, %v3859_v45 }
 0x3ab   : > { %v951_v15 = vsel %vm390_vm7, %v3838_v39, %v3837_v1 }
 0x3ac   : > { %v982_v47 = vsel %vm279_vm8, %v3255_v35, %v951_v15  ;;  %v985_v35 = vpack.c.bf16 %v3219_v34, %v3211_v57  ;;  %v3848_v57 = vunpack.i.h.bf16 %v3177_v32  ;;  %v3853_v32 = vld [vmem:[#allocation24_spill] sm:$0xff] }
 0x3ad   : > { %1308 = vmatpush1.bf16.msra.mxu1 %v3000_v48  ;;  %v980_v48 = vsel %vm279_vm8, %v3191_v26, %v950_v28  ;;  %v3839_v26 = vpack.c.bf16 %v3121_v8, %v3116_v62  ;;  %v1037_v62 = vsel %vm390_vm7, %v3842_v60, %v3841_v25  ;;  %v3843_v8 = vunpack.i.h.bf16 %v3171_v42  ;;  %v1976_v25 = vld [vmem:[%s2301_s12 + $0x8] sm:$0xff] }
 0x3ae   : > { %1309 = vmatprep.subr.bf16.mxu1 %v3833_v55  ;;  %v986_v6 = vpack.c.bf16 %v980_v48, %v978_v4  ;;  %v988_v53 = vpack.c.bf16 %v984_v52, %v982_v47  ;;  %v1066_v24 = vsel %vm279_vm8, %v3245_v16, %v1037_v62  ;;  %v3845_v42 = vunpack.i.l.bf16 %v3179_v33  ;;  %v3849_v16 = vld [vmem:[#allocation21_spill] sm:$0xff] }
 0x3af   : > { %v1038_v12 = vsel %vm390_vm7, %v3844_v11, %v3843_v8  ;;  %v1040_v34 = vsel %vm390_vm7, %v3848_v57, %v3847_v59  ;;  %v987_v58 = vpack.c.bf16 %v3849_v16, %v3301_v41  ;;  %v3852_v33 = vunpack.i.h.bf16 %v3349_v31  ;;  %v1977_v8 = vld [vmem:[%s2301_s12 + $0x10] sm:$0xff]  ;;  %v1979_v57 = vld [vmem:[%s2301_s12 + $0x20] sm:$0xff] }
 0x3b0   : > { %v1068_v9 = vsel %vm279_vm8, %v3249_v50, %v1038_v12  ;;  %v1039_v17 = vsel %vm390_vm7, %v3846_v27, %v3845_v42  ;;  %v3850_v50 = vld [vmem:[#allocation19_spill] sm:$0xff]  ;;  %v1072_v19 = vsel %vm279_vm8, %v3851_v30, %v1040_v34  ;;  %v3854_v5 = vunpack.i.h.bf16 %v3853_v32  ;;  %v1978_v12 = vld [vmem:[%s2301_s12 + $0x18] sm:$0xff]  ;;  %v1981_v30 = vld [vmem:[%s2301_s12 + $0x30] sm:$0xff] }
 0x3b1   : > { %1310 = vmatpush1.bf16.msra.mxu1 %v3834_v3  ;;  %v1074_v38 = vpack.c.bf16 %v1068_v9, %v1066_v24  ;;  %v1070_v10 = vsel %vm279_vm8, %v3850_v50, %v1039_v17  ;;  %v3856_v41 = vunpack.i.l.bf16 %v3853_v32  ;;  %v1073_v28 = vpack.c.bf16 %v3858_v61, %v3857_v43 }
 0x3b2   : > { %1311 = vmatprep.subr.bf16.mxu1 %v3839_v26  ;;  %v1134_v36 = vsel %vm390_vm7, %v3854_v5, %v3852_v33  ;;  %v1076_v55 = vpack.c.bf16 %v1072_v19, %v1070_v10  ;;  %v1136_v31 = vsel %vm390_vm7, %v1958_v44, %v1953_v21  ;;  %v1135_v3 = vsel %vm390_vm7, %v1957_v23, %v1952_v40  ;;  %v1970_v21 = vld [vmem:[#allocation6 + $0x1c] ss:$12 sps:$4 sm:$0xff]   ;;  %v1972_v40 = vld [vmem:[#allocation6 + $0x18] ss:$12 sps:$4 sm:$0xff]  }
 0x3b3   : > { %v1133_v18 = vsel %vm390_vm7, %v3856_v41, %v3855_v20  ;;  %v1164_v48 = vsel %vm279_vm8, %v3367_v63, %v1134_v36  ;;  %v1166_v63 = vsel %vm279_vm8, %v3403_v22, %v1135_v3  ;;  %v1168_v44 = vsel %vm279_vm8, %v3407_v37, %v1136_v31  ;;  %v1982_v33 = vld [vmem:[%s2301_s12 + $0x38] sm:$0xff] }
 0x3b4   : > { %v1162_v4 = vsel %vm279_vm8, %v3363_v51, %v1133_v18  ;;  %v1967_v51 = vld [vmem:[#allocation6] ss:$12 sps:$4 sm:$0xff]   ;;  %v1172_v54 = vpack.c.bf16 %v1168_v44, %v1166_v63  ;;  %v1171_v23 = vpack.c.bf16 %v3423_v49, %v3429_v2  ;;  %v3861_v22 = vmov 0   ;;  %v1245_v49 = vpop.permute.xlu0 %1244 }
 0x3b5   : > { %1312 = vmatpush1.bf16.msra.mxu1 %v3840_v7  ;;  %v1170_v1 = vpack.c.bf16 %v1164_v48, %v1162_v4 }
 0x3b6   : > { %1313 = vmatprep.subr.bf16.mxu1 %v986_v6  ;;  %v1975_v6 = vld [vmem:[%s2301_s12] sm:$0xff] }
 0x3b8   : > { %v1255_v27 = vpop.permute.xlu0 %1254 }
 0x3b9   : > { %1314 = vmatpush1.bf16.msra.mxu1 %v985_v35 }
 0x3ba   : > { %1315 = vmatprep.subr.bf16.mxu1 %v988_v53  ;;  %v1250_v53 = vpop.permute.xlu1 %1249 }
 0x3bd   : > { %1316 = vmatpush1.bf16.msra.mxu1 %v987_v58 }
 0x3be   : > { %1317 = vmatprep.subr.bf16.mxu1 %v1074_v38  ;;  %v1980_v38 = vld [vmem:[%s2301_s12 + $0x28] sm:$0xff] }
 0x3c1   : > { %1318 = vmatpush1.bf16.msra.mxu1 %v1073_v28 }
 0x3c2   : > { %1319 = vmatprep.subr.bf16.mxu1 %v1076_v55 }
 0x3c5   : > { %1320 = vmatpush1.bf16.msra.mxu1 %v1075_v0 }
 0x3c6   : > { %1342 = vmatprep.subr.bf16.mxu1 %v1170_v1 }
 0x3c8   : > { %1322 = vmatmul.mubr.bf16.vlgmr.msra.gmra.mrb[0].mxu1 %v1967_v51 }
 0x3c9   : > { %1343 = vmatpush1.bf16.msra.mxu1 %v1169_v13  ;;  %1331 = vmatprep.mubr.bf16.mxu1 %v1970_v21 }
 0x3ca   : > { %1344 = vmatprep.subr.bf16.mxu1 %v1172_v54 }
 0x3cd   : > { %1345 = vmatpush1.bf16.msra.mxu1 %v1171_v23 }
 0x3d0   : > { %1332 = vmatmul.mubr.bf16.gmra.mrb[4].mxu1 %v1972_v40 }
 0x3d1   : > { %1374 = vmatprep.mubr.bf16.mxu1 %v3861_v22 }
 0x3d8   : > { %1375 = vmatmul.mubr.bf16.vlgmr.msra.gmra.mrb[0].mxu1 %v1973_v14 }
 0x3d9   : > { %1384 = vmatprep.mubr.bf16.mxu1 %v3861_v22 }
 0x3e0   : > { %1385 = vmatmul.mubr.bf16.gmra.mrb[4].mxu1 %v1974_v29 }
 0x4ab   : > { %v1376_v37 = vpop.f32.mrb[0].mxu1 }
 0x4ac   : > { %v1546_v39 = vadd.f32 %v1376_v37, %v1240_v56  ;;  %v1378_v15 = vpop.f32.mrb[1].mxu1 }
 0x4ad   : > { %v1547_v2 = vadd.f32 %v1378_v15, %v1240_v56  ;;  %v1380_v26 = vpop.f32.mrb[2].mxu1 }
 0x4ae   : > { %v1395_v7 = vadd.f32 %v1975_v6, %v1546_v39  ;;  %v1548_v47 = vadd.f32 %v1380_v26, %v1245_v49  ;;  %v1382_v52 = vpop.f32.mrb[3].mxu1 }
 0x4af   : > { %v1396_v60 = vadd.f32 %v1976_v25, %v1547_v2  ;;  %v1549_v62 = vadd.f32 %v1382_v52, %v1245_v49 }
 0x4b0   : > { %1403 = vst [vmem:[%s3587_s6] sm:$0xff] %v1395_v7  ;;  %v1397_v11 = vadd.f32 %v1977_v8, %v1548_v47 }
 0x4b1   : > { %1404 = vst [vmem:[%s3587_s6 + $0x8] sm:$0xff] %v1396_v60  ;;  %v1398_v35 = vadd.f32 %v1978_v12, %v1549_v62 }
 0x4b2   : > { %1405 = vst [vmem:[%s3587_s6 + $0x10] sm:$0xff] %v1397_v11 }
 0x4b3   : > { %1406 = vst [vmem:[%s3587_s6 + $0x18] sm:$0xff] %v1398_v35  ;;  %v1386_v24 = vpop.f32.mrb[4].mxu1 }
 0x4b4   : > { %v1550_v9 = vadd.f32 %v1386_v24, %v1250_v53  ;;  %v1388_v42 = vpop.f32.mrb[5].mxu1 }
 0x4b5   : > { %v1551_v17 = vadd.f32 %v1388_v42, %v1250_v53  ;;  %v1390_v59 = vpop.f32.mrb[6].mxu1 }
 0x4b6   : > { %v1399_v34 = vadd.f32 %v1979_v57, %v1550_v9  ;;  %v1552_v16 = vadd.f32 %v1390_v59, %v1255_v27  ;;  %v1392_v58 = vpop.f32.mrb[7].mxu1 }
 0x4b7   : > { %v1400_v50 = vadd.f32 %v1980_v38, %v1551_v17  ;;  %v1553_v10 = vadd.f32 %v1392_v58, %v1255_v27 }
 0x4b8   : > { %1407 = vst [vmem:[%s3587_s6 + $0x20] sm:$0xff] %v1399_v34  ;;  %v1401_v19 = vadd.f32 %v1981_v30, %v1552_v16 }
 0x4b9   : > { %1408 = vst [vmem:[%s3587_s6 + $0x28] sm:$0xff] %v1400_v50  ;;  %v1402_v32 = vadd.f32 %v1982_v33, %v1553_v10 }
 0x4ba   : > { %1409 = vst [vmem:[%s3587_s6 + $0x30] sm:$0xff] %v1401_v19 }
 0x4bb   : > { %1410 = vst [vmem:[%s3587_s6 + $0x38] sm:$0xff] %v1402_v32 }
 0x4bc   : > { %2054 = shalt.err (!%p2051_p7)
}
 0x4bd   : > { %s2055_s12 = scalar_lea.hbm %s3608_s24, 1024  ;;  %s2059_s17 = scalar_lea.hbm %s3660_s5, 2048 }
 0x4be   : > { %p2056_p9 = scmp.ne.s32.totalorder %s3608_s24, %s2055_s12  ;;  %p2060_p5 = scmp.lt.u32.totalorder %s3608_s24, %s3660_s5 }
 0x4bf   : > { %p2061_p11 = scmp.lt.u32.totalorder %s2059_s17, %s2055_s12  ;;  %p2063_p4 = scmp.lt.u32.totalorder %s2055_s12, %s3608_s24 }
 0x4c0   : > { %p2057_p2 = pnand %p2056_p9, %p2247_p12 }
 0x4c1   : > { %p2062_p1 = por %p2061_p11, %p2060_p5 }
 0x4c2   : > { %p2058_p0 = pneg %p2057_p2 }
 0x4c3   : > { %p2064_p6 = por %p2063_p4, %p2062_p1 }
 0x4c5   : > { %p2065_p8 = pnand %p2064_p6, %p2058_p0 }
 0x4c7   : > { %2068 = shalt.err (!%p2065_p8)
}
 0x4c8   : > { %s2125_s7 = smov 256  }
 0x4c9   : > { %1576 = dma.vmem_to_hbm [thread:$0]  (%p2247_p12), %s3599_s27, 1024, %s3608_s24, %s1412_s22, %s2125_s7, %s2125_s7, %s2121_s14  }
 0x4ca PF: > { %s1440_s15 = sand.u32 1, %s2099_s18   ;;  %p3862_p10 = scmp.ne.s32.totalorder %s3731_s25, 0 }
 0x4cb   : > { %p3863_p13 = scmp.ge.s32.totalorder %s2111_s21, 2  ;;  %s1441_s26 = scalar_lea.sflag [#allocation5], %s1440_s15 }
 0x4cd   : > { %p1587_p3 = pnand %p3863_p13, %p3862_p10 }
 0x4cf   : > { %2094 = dma.done.wait (!%p1587_p3), %s1441_s26, 1024  }
 0x4d0   : > { %2096 = vsyncadd (!%p1587_p3), %s1441_s26, 4294966272  ;;  %p19_p7 = scmp.ge.s32.totalorder %s2212_s30, 4   ;;  %s3864_s18 = smov %s2103_s19 }
 0x4d1   : > { %s3865_s19 = smov %s2107_s20  ;;  %s3866_s20 = smov %s2243_s8 }
 0x4d2   : > { %s3867_s21 = smov %s2212_s30  ;;  %21 = sbr.rel (!%p19_p7) target bundleno = 6 (0x6), region = 89 }
 0x4d9   :  { %1446 = vsyncpa [#allocation4], 1 }
 0x4da   :  { %1448 = vsyncpa [#allocation4 + $0x1], 1 }
 0x4db   :  { %1449 = vsyncpa [#allocation7], 1 }
 0x4dc   :  { %1450 = vsyncpa [#allocation5], 1 }
 0x4dd   :  { %1452 = vsyncpa [#allocation5 + $0x1], 1 }

</bundles_post_ra>
